<compile_context>
chip_gen: v7x
topology: tpu7x:2x2x1
jax: 0.10.0
libtpu: 0.0.40
codegen_flags: <defaults>
</compile_context>

<pallas_src>
import functools

import jax
import jax.numpy as jnp
import numpy as np
from jax.experimental import pallas as pl
from jax.experimental.pallas import tpu as pltpu


def _round_up(x, m):
    return ((x + m - 1) // m) * m


def _gcn_kernel(seed_ref, x_ref, a_ref, w_ref, b_ref, o_ref, *,
                num_supports, order, c_in, c_out, rows_per_block, v_pad,
                dropout_rate, training):
    """Fused GCN block for one tile of `rows_per_block` (n, l) rows.

    x_ref : (rows_per_block * c_in, v_pad)   rows ordered (row, in_channel)
    a_ref : (num_supports, v_pad, v_pad)     all supports, VMEM resident
    w_ref : (num_terms, c_out, c_in)         1x1-conv weight split per term
    b_ref : (c_out, 1)                       bias
    o_ref : (rows_per_block * c_out, v_pad)  rows ordered (row, out_channel)
    """
    f32 = jnp.float32
    xin = x_ref[...].astype(f32)                                     # (Rb*C, Vp)
    bias = jnp.broadcast_to(b_ref[...].astype(f32), (c_out, v_pad))  # (c_out, Vp)

    # Term 0: identity term (raw x), projected by W[:, 0:C]; bias added once.
    w0 = w_ref[0].astype(f32)                                        # (c_out, C)
    accs = [bias + jnp.dot(w0, xin[r * c_in:(r + 1) * c_in, :],
                           preferred_element_type=f32)
            for r in range(rows_per_block)]

    # Propagation chain per support; each term is projected and accumulated
    # immediately (no concatenated `h` ever exists).
    term = 1
    for s in range(num_supports):
        a = a_ref[s].astype(f32)                                     # (Vp, Vp)
        cur = xin
        for _ in range(order):
            # nconv: contract the graph-node (lane) dim against A on the MXU.
            cur = jnp.dot(cur, a, preferred_element_type=f32)        # (Rb*C, Vp)
            wt = w_ref[term].astype(f32)                             # (c_out, C)
            for r in range(rows_per_block):
                accs[r] = accs[r] + jnp.dot(
                    wt, cur[r * c_in:(r + 1) * c_in, :],
                    preferred_element_type=f32)
            term += 1

    out = jnp.concatenate(accs, axis=0)                              # (Rb*c_out, Vp)

    if training and dropout_rate > 0.0:
        # Fused dropout: Bernoulli keep mask from the TPU PRNG, 1/(1-p) scale.
        # TODO(synk): RNG stream differs bitwise from torch F.dropout (semantics match).
        pltpu.prng_seed(seed_ref[0] + pl.program_id(0))
        bits = pltpu.bitcast(pltpu.prng_random_bits(out.shape), jnp.uint32)
        thresh = jnp.uint32(min(int(dropout_rate * (2.0 ** 32)), 2 ** 32 - 1))
        keep = bits >= thresh
        out = jnp.where(keep, out * (1.0 / (1.0 - dropout_rate)),
                        jnp.zeros_like(out))

    o_ref[...] = out.astype(o_ref.dtype)


def gcn_forward(x, supports, weight, bias, *, order=2, dropout=0.3,
                training=False, seed=0, rows_per_block=16):
    """Fused forward pass of the gcn module.

    x:        (N, C, V, L) float array (NCHW, V = graph nodes, L = time steps)
    supports: list of (V, V) adjacency matrices
    weight:   (c_out, C_total[, 1, 1]) 1x1-conv weight, C_total = (order*S+1)*C
    bias:     (c_out,)
    Returns:  (N, c_out, V, L)
    """
    N, C, V, L = x.shape
    S = len(supports)
    T = 1 + order * S
    w2d = weight.reshape(weight.shape[0], -1)
    c_out, c_total = w2d.shape
    assert c_total == T * C, f"weight c_in {c_total} != (order*S+1)*C = {T * C}"

    v_pad = _round_up(max(V, 128), 128)
    rows = N * L
    rb = max(8, (min(rows_per_block, _round_up(rows, 8)) // 8) * 8)
    rows_pad = _round_up(rows, rb)

    # x: (N,C,V,L) -> zero-pad V -> rows ordered (n, l, c), lanes = padded V.
    xp = jnp.pad(x, ((0, 0), (0, 0), (0, v_pad - V), (0, 0)))
    xk = jnp.transpose(xp, (0, 3, 1, 2)).reshape(rows * C, v_pad)
    if rows_pad > rows:
        xk = jnp.pad(xk, ((0, (rows_pad - rows) * C), (0, 0)))

    a_stack = jnp.stack([jnp.pad(a, ((0, v_pad - V), (0, v_pad - V)))
                         for a in supports])                         # (S, Vp, Vp)
    # Weight column blocks in PyTorch cat order: [x, s0^1..s0^k, s1^1.., ...]
    w_stack = jnp.transpose(w2d.reshape(c_out, T, C), (1, 0, 2))     # (T, c_out, C)
    b_col = bias.reshape(c_out, 1)
    seed_arr = jnp.array([seed], dtype=jnp.int32)

    grid = (rows_pad // rb,)
    kernel = functools.partial(
        _gcn_kernel, num_supports=S, order=order, c_in=C, c_out=c_out,
        rows_per_block=rb, v_pad=v_pad, dropout_rate=float(dropout),
        training=bool(training))

    out_flat = pl.pallas_call(
        kernel,
        out_shape=jax.ShapeDtypeStruct((rows_pad * c_out, v_pad), x.dtype),
        grid=grid,
        in_specs=[
            pl.BlockSpec(memory_space=pltpu.MemorySpace.SMEM),       # dropout seed
            pl.BlockSpec((rb * C, v_pad), lambda i: (i, 0)),         # x row tile
            pl.BlockSpec((S, v_pad, v_pad), lambda i: (0, 0, 0)),    # supports (resident)
            pl.BlockSpec((T, c_out, C), lambda i: (0, 0, 0)),        # weights  (resident)
            pl.BlockSpec((c_out, 1), lambda i: (0, 0)),              # bias     (resident)
        ],
        out_specs=pl.BlockSpec((rb * c_out, v_pad), lambda i: (i, 0)),
        compiler_params=pltpu.CompilerParams(
            dimension_semantics=("parallel",)),
    )(seed_arr, xk, a_stack, w_stack, b_col)

    y = out_flat[:rows * c_out].reshape(N, L, c_out, v_pad)[..., :V]
    return jnp.transpose(y, (0, 2, 3, 1))                            # (N, c_out, V, L)


def gcn_reference(x, supports, weight, bias, order):
    """Pure-JAX reference matching the PyTorch module (eval mode)."""
    out = [x]
    for a in supports:
        x1 = jnp.einsum('ncvl,vw->ncwl', x, a)
        out.append(x1)
        for _ in range(2, order + 1):
            x2 = jnp.einsum('ncvl,vw->ncwl', x1, a)
            out.append(x2)
            x1 = x2
    h = jnp.concatenate(out, axis=1)
    w2d = weight.reshape(weight.shape[0], -1)
    y = jnp.einsum('oc,ncvl->novl', w2d, h)
    return y + bias[None, :, None, None]


if __name__ == "__main__":
    key = jax.random.PRNGKey(0)
    N, C, V, L = 2, 8, 16, 8
    support_len, order, c_out = 3, 2, 16
    dropout = 0.3
    C_total = (order * support_len + 1) * C

    keys = jax.random.split(key, 3 + support_len)
    x = jax.random.normal(keys[0], (N, C, V, L), dtype=jnp.float32)
    weight = jax.random.normal(keys[1], (c_out, C_total, 1, 1),
                               dtype=jnp.float32) * 0.05
    bias = jax.random.normal(keys[2], (c_out,), dtype=jnp.float32) * 0.1
    supports = [jax.random.normal(keys[3 + s], (V, V), dtype=jnp.float32) * 0.1
                for s in range(support_len)]

    y = gcn_forward(x, supports, weight, bias, order=order, dropout=dropout,
                    training=False)   # eval mode: dropout is identity
    y = jax.block_until_ready(y)

    y_ref = gcn_reference(x, supports, weight, bias, order)
    if not np.allclose(np.asarray(y), np.asarray(y_ref), rtol=1e-3, atol=1e-3):
        err = float(jnp.max(jnp.abs(y - y_ref)))
        raise AssertionError(f"kernel mismatch vs reference, max abs err {err}")

    print("KERNEL_OK")
</pallas_src>

<mosaic_0001>
module attributes {stable_mosaic.version = 11 : i64} {
  func.func @_gcn_kernel(%arg0: i32, %arg1: memref<1xi32, #tpu.memory_space<smem>>, %arg2: memref<128x128xf32, #tpu.memory_space<vmem>>, %arg3: memref<3x128x128xf32, #tpu.memory_space<vmem>>, %arg4: memref<7x16x8xf32, #tpu.memory_space<vmem>>, %arg5: memref<16x1xf32, #tpu.memory_space<vmem>>, %arg6: memref<256x128xf32, #tpu.memory_space<vmem>>) attributes {dimension_semantics = [#tpu.dimension_semantics<parallel>], iteration_bounds = array<i64: 1>, scalar_prefetch = 0 : i64, scratch_operands = 0 : i64, tpu.core_type = #tpu.core_type<tc>, window_params = [{transform_indices = @transform_0, window_bounds = array<i64: 1>}, {transform_indices = @transform_1, window_bounds = array<i64: 128, 128>}, {pipeline_mode = #tpu.pipeline_mode<synchronous>, transform_indices = @transform_2, window_bounds = array<i64: 3, 128, 128>}, {pipeline_mode = #tpu.pipeline_mode<synchronous>, transform_indices = @transform_3, window_bounds = array<i64: 7, 16, 8>}, {pipeline_mode = #tpu.pipeline_mode<synchronous>, transform_indices = @transform_4, window_bounds = array<i64: 16, 1>}, {transform_indices = @transform_5, window_bounds = array<i64: 256, 128>}]} {
    %c0 = arith.constant 0 : index
    %c0_0 = arith.constant 0 : index
    %0 = vector.load %arg2[%c0, %c0_0] : memref<128x128xf32, #tpu.memory_space<vmem>>, vector<128x128xf32>
    %c0_1 = arith.constant 0 : index
    %c0_2 = arith.constant 0 : index
    %1 = vector.load %arg5[%c0_1, %c0_2] : memref<16x1xf32, #tpu.memory_space<vmem>>, vector<16x1xf32>
    %2 = vector.shape_cast %1 : vector<16x1xf32> to vector<16x1xf32>
    %3 = vector.broadcast %2 : vector<16x1xf32> to vector<16x128xf32>
    %c0_3 = arith.constant 0 : index
    %c0_4 = arith.constant 0 : index
    %c0_5 = arith.constant 0 : index
    %4 = vector.load %arg4[%c0_3, %c0_4, %c0_5] : memref<7x16x8xf32, #tpu.memory_space<vmem>>, vector<1x16x8xf32>
    %5 = vector.shape_cast %4 : vector<1x16x8xf32> to vector<16x8xf32>
    %6 = vector.extract_strided_slice %0 {offsets = [0, 0], sizes = [8, 128], strides = [1, 1]} : vector<128x128xf32> to vector<8x128xf32>
    %cst = arith.constant dense<0.000000e+00> : vector<16x128xf32>
    %7 = tpu.matmul %5, %6, %cst {dimension_numbers = #tpu.dot_dimension_numbers<[1], [0], [0], [1], [0, 0, 1, 1], [], []>} : vector<16x8xf32>, vector<8x128xf32>, vector<16x128xf32> -> vector<16x128xf32>
    %8 = arith.addf %3, %7 : vector<16x128xf32>
    %9 = vector.extract_strided_slice %0 {offsets = [8, 0], sizes = [8, 128], strides = [1, 1]} : vector<128x128xf32> to vector<8x128xf32>
    %cst_6 = arith.constant dense<0.000000e+00> : vector<16x128xf32>
    %10 = tpu.matmul %5, %9, %cst_6 {dimension_numbers = #tpu.dot_dimension_numbers<[1], [0], [0], [1], [0, 0, 1, 1], [], []>} : vector<16x8xf32>, vector<8x128xf32>, vector<16x128xf32> -> vector<16x128xf32>
    %11 = arith.addf %3, %10 : vector<16x128xf32>
    %12 = vector.extract_strided_slice %0 {offsets = [16, 0], sizes = [8, 128], strides = [1, 1]} : vector<128x128xf32> to vector<8x128xf32>
    %cst_7 = arith.constant dense<0.000000e+00> : vector<16x128xf32>
    %13 = tpu.matmul %5, %12, %cst_7 {dimension_numbers = #tpu.dot_dimension_numbers<[1], [0], [0], [1], [0, 0, 1, 1], [], []>} : vector<16x8xf32>, vector<8x128xf32>, vector<16x128xf32> -> vector<16x128xf32>
    %14 = arith.addf %3, %13 : vector<16x128xf32>
    %15 = vector.extract_strided_slice %0 {offsets = [24, 0], sizes = [8, 128], strides = [1, 1]} : vector<128x128xf32> to vector<8x128xf32>
    %cst_8 = arith.constant dense<0.000000e+00> : vector<16x128xf32>
    %16 = tpu.matmul %5, %15, %cst_8 {dimension_numbers = #tpu.dot_dimension_numbers<[1], [0], [0], [1], [0, 0, 1, 1], [], []>} : vector<16x8xf32>, vector<8x128xf32>, vector<16x128xf32> -> vector<16x128xf32>
    %17 = arith.addf %3, %16 : vector<16x128xf32>
    %18 = vector.extract_strided_slice %0 {offsets = [32, 0], sizes = [8, 128], strides = [1, 1]} : vector<128x128xf32> to vector<8x128xf32>
    %cst_9 = arith.constant dense<0.000000e+00> : vector<16x128xf32>
    %19 = tpu.matmul %5, %18, %cst_9 {dimension_numbers = #tpu.dot_dimension_numbers<[1], [0], [0], [1], [0, 0, 1, 1], [], []>} : vector<16x8xf32>, vector<8x128xf32>, vector<16x128xf32> -> vector<16x128xf32>
    %20 = arith.addf %3, %19 : vector<16x128xf32>
    %21 = vector.extract_strided_slice %0 {offsets = [40, 0], sizes = [8, 128], strides = [1, 1]} : vector<128x128xf32> to vector<8x128xf32>
    %cst_10 = arith.constant dense<0.000000e+00> : vector<16x128xf32>
    %22 = tpu.matmul %5, %21, %cst_10 {dimension_numbers = #tpu.dot_dimension_numbers<[1], [0], [0], [1], [0, 0, 1, 1], [], []>} : vector<16x8xf32>, vector<8x128xf32>, vector<16x128xf32> -> vector<16x128xf32>
    %23 = arith.addf %3, %22 : vector<16x128xf32>
    %24 = vector.extract_strided_slice %0 {offsets = [48, 0], sizes = [8, 128], strides = [1, 1]} : vector<128x128xf32> to vector<8x128xf32>
    %cst_11 = arith.constant dense<0.000000e+00> : vector<16x128xf32>
    %25 = tpu.matmul %5, %24, %cst_11 {dimension_numbers = #tpu.dot_dimension_numbers<[1], [0], [0], [1], [0, 0, 1, 1], [], []>} : vector<16x8xf32>, vector<8x128xf32>, vector<16x128xf32> -> vector<16x128xf32>
    %26 = arith.addf %3, %25 : vector<16x128xf32>
    %27 = vector.extract_strided_slice %0 {offsets = [56, 0], sizes = [8, 128], strides = [1, 1]} : vector<128x128xf32> to vector<8x128xf32>
    %cst_12 = arith.constant dense<0.000000e+00> : vector<16x128xf32>
    %28 = tpu.matmul %5, %27, %cst_12 {dimension_numbers = #tpu.dot_dimension_numbers<[1], [0], [0], [1], [0, 0, 1, 1], [], []>} : vector<16x8xf32>, vector<8x128xf32>, vector<16x128xf32> -> vector<16x128xf32>
    %29 = arith.addf %3, %28 : vector<16x128xf32>
    %30 = vector.extract_strided_slice %0 {offsets = [64, 0], sizes = [8, 128], strides = [1, 1]} : vector<128x128xf32> to vector<8x128xf32>
    %cst_13 = arith.constant dense<0.000000e+00> : vector<16x128xf32>
    %31 = tpu.matmul %5, %30, %cst_13 {dimension_numbers = #tpu.dot_dimension_numbers<[1], [0], [0], [1], [0, 0, 1, 1], [], []>} : vector<16x8xf32>, vector<8x128xf32>, vector<16x128xf32> -> vector<16x128xf32>
    %32 = arith.addf %3, %31 : vector<16x128xf32>
    %33 = vector.extract_strided_slice %0 {offsets = [72, 0], sizes = [8, 128], strides = [1, 1]} : vector<128x128xf32> to vector<8x128xf32>
    %cst_14 = arith.constant dense<0.000000e+00> : vector<16x128xf32>
    %34 = tpu.matmul %5, %33, %cst_14 {dimension_numbers = #tpu.dot_dimension_numbers<[1], [0], [0], [1], [0, 0, 1, 1], [], []>} : vector<16x8xf32>, vector<8x128xf32>, vector<16x128xf32> -> vector<16x128xf32>
    %35 = arith.addf %3, %34 : vector<16x128xf32>
    %36 = vector.extract_strided_slice %0 {offsets = [80, 0], sizes = [8, 128], strides = [1, 1]} : vector<128x128xf32> to vector<8x128xf32>
    %cst_15 = arith.constant dense<0.000000e+00> : vector<16x128xf32>
    %37 = tpu.matmul %5, %36, %cst_15 {dimension_numbers = #tpu.dot_dimension_numbers<[1], [0], [0], [1], [0, 0, 1, 1], [], []>} : vector<16x8xf32>, vector<8x128xf32>, vector<16x128xf32> -> vector<16x128xf32>
    %38 = arith.addf %3, %37 : vector<16x128xf32>
    %39 = vector.extract_strided_slice %0 {offsets = [88, 0], sizes = [8, 128], strides = [1, 1]} : vector<128x128xf32> to vector<8x128xf32>
    %cst_16 = arith.constant dense<0.000000e+00> : vector<16x128xf32>
    %40 = tpu.matmul %5, %39, %cst_16 {dimension_numbers = #tpu.dot_dimension_numbers<[1], [0], [0], [1], [0, 0, 1, 1], [], []>} : vector<16x8xf32>, vector<8x128xf32>, vector<16x128xf32> -> vector<16x128xf32>
    %41 = arith.addf %3, %40 : vector<16x128xf32>
    %42 = vector.extract_strided_slice %0 {offsets = [96, 0], sizes = [8, 128], strides = [1, 1]} : vector<128x128xf32> to vector<8x128xf32>
    %cst_17 = arith.constant dense<0.000000e+00> : vector<16x128xf32>
    %43 = tpu.matmul %5, %42, %cst_17 {dimension_numbers = #tpu.dot_dimension_numbers<[1], [0], [0], [1], [0, 0, 1, 1], [], []>} : vector<16x8xf32>, vector<8x128xf32>, vector<16x128xf32> -> vector<16x128xf32>
    %44 = arith.addf %3, %43 : vector<16x128xf32>
    %45 = vector.extract_strided_slice %0 {offsets = [104, 0], sizes = [8, 128], strides = [1, 1]} : vector<128x128xf32> to vector<8x128xf32>
    %cst_18 = arith.constant dense<0.000000e+00> : vector<16x128xf32>
    %46 = tpu.matmul %5, %45, %cst_18 {dimension_numbers = #tpu.dot_dimension_numbers<[1], [0], [0], [1], [0, 0, 1, 1], [], []>} : vector<16x8xf32>, vector<8x128xf32>, vector<16x128xf32> -> vector<16x128xf32>
    %47 = arith.addf %3, %46 : vector<16x128xf32>
    %48 = vector.extract_strided_slice %0 {offsets = [112, 0], sizes = [8, 128], strides = [1, 1]} : vector<128x128xf32> to vector<8x128xf32>
    %cst_19 = arith.constant dense<0.000000e+00> : vector<16x128xf32>
    %49 = tpu.matmul %5, %48, %cst_19 {dimension_numbers = #tpu.dot_dimension_numbers<[1], [0], [0], [1], [0, 0, 1, 1], [], []>} : vector<16x8xf32>, vector<8x128xf32>, vector<16x128xf32> -> vector<16x128xf32>
    %50 = arith.addf %3, %49 : vector<16x128xf32>
    %51 = vector.extract_strided_slice %0 {offsets = [120, 0], sizes = [8, 128], strides = [1, 1]} : vector<128x128xf32> to vector<8x128xf32>
    %cst_20 = arith.constant dense<0.000000e+00> : vector<16x128xf32>
    %52 = tpu.matmul %5, %51, %cst_20 {dimension_numbers = #tpu.dot_dimension_numbers<[1], [0], [0], [1], [0, 0, 1, 1], [], []>} : vector<16x8xf32>, vector<8x128xf32>, vector<16x128xf32> -> vector<16x128xf32>
    %53 = arith.addf %3, %52 : vector<16x128xf32>
    %c0_21 = arith.constant 0 : index
    %c0_22 = arith.constant 0 : index
    %c0_23 = arith.constant 0 : index
    %54 = vector.load %arg3[%c0_21, %c0_22, %c0_23] : memref<3x128x128xf32, #tpu.memory_space<vmem>>, vector<1x128x128xf32>
    %55 = vector.shape_cast %54 : vector<1x128x128xf32> to vector<128x128xf32>
    %cst_24 = arith.constant dense<0.000000e+00> : vector<128x128xf32>
    %56 = tpu.matmul %0, %55, %cst_24 {dimension_numbers = #tpu.dot_dimension_numbers<[1], [0], [0], [1], [0, 0, 1, 1], [], []>} : vector<128x128xf32>, vector<128x128xf32>, vector<128x128xf32> -> vector<128x128xf32>
    %c1 = arith.constant 1 : index
    %c0_25 = arith.constant 0 : index
    %c0_26 = arith.constant 0 : index
    %57 = vector.load %arg4[%c1, %c0_25, %c0_26] : memref<7x16x8xf32, #tpu.memory_space<vmem>>, vector<1x16x8xf32>
    %58 = vector.shape_cast %57 : vector<1x16x8xf32> to vector<16x8xf32>
    %59 = vector.extract_strided_slice %56 {offsets = [0, 0], sizes = [8, 128], strides = [1, 1]} : vector<128x128xf32> to vector<8x128xf32>
    %cst_27 = arith.constant dense<0.000000e+00> : vector<16x128xf32>
    %60 = tpu.matmul %58, %59, %cst_27 {dimension_numbers = #tpu.dot_dimension_numbers<[1], [0], [0], [1], [0, 0, 1, 1], [], []>} : vector<16x8xf32>, vector<8x128xf32>, vector<16x128xf32> -> vector<16x128xf32>
    %61 = arith.addf %8, %60 : vector<16x128xf32>
    %62 = vector.extract_strided_slice %56 {offsets = [8, 0], sizes = [8, 128], strides = [1, 1]} : vector<128x128xf32> to vector<8x128xf32>
    %cst_28 = arith.constant dense<0.000000e+00> : vector<16x128xf32>
    %63 = tpu.matmul %58, %62, %cst_28 {dimension_numbers = #tpu.dot_dimension_numbers<[1], [0], [0], [1], [0, 0, 1, 1], [], []>} : vector<16x8xf32>, vector<8x128xf32>, vector<16x128xf32> -> vector<16x128xf32>
    %64 = arith.addf %11, %63 : vector<16x128xf32>
    %65 = vector.extract_strided_slice %56 {offsets = [16, 0], sizes = [8, 128], strides = [1, 1]} : vector<128x128xf32> to vector<8x128xf32>
    %cst_29 = arith.constant dense<0.000000e+00> : vector<16x128xf32>
    %66 = tpu.matmul %58, %65, %cst_29 {dimension_numbers = #tpu.dot_dimension_numbers<[1], [0], [0], [1], [0, 0, 1, 1], [], []>} : vector<16x8xf32>, vector<8x128xf32>, vector<16x128xf32> -> vector<16x128xf32>
    %67 = arith.addf %14, %66 : vector<16x128xf32>
    %68 = vector.extract_strided_slice %56 {offsets = [24, 0], sizes = [8, 128], strides = [1, 1]} : vector<128x128xf32> to vector<8x128xf32>
    %cst_30 = arith.constant dense<0.000000e+00> : vector<16x128xf32>
    %69 = tpu.matmul %58, %68, %cst_30 {dimension_numbers = #tpu.dot_dimension_numbers<[1], [0], [0], [1], [0, 0, 1, 1], [], []>} : vector<16x8xf32>, vector<8x128xf32>, vector<16x128xf32> -> vector<16x128xf32>
    %70 = arith.addf %17, %69 : vector<16x128xf32>
    %71 = vector.extract_strided_slice %56 {offsets = [32, 0], sizes = [8, 128], strides = [1, 1]} : vector<128x128xf32> to vector<8x128xf32>
    %cst_31 = arith.constant dense<0.000000e+00> : vector<16x128xf32>
    %72 = tpu.matmul %58, %71, %cst_31 {dimension_numbers = #tpu.dot_dimension_numbers<[1], [0], [0], [1], [0, 0, 1, 1], [], []>} : vector<16x8xf32>, vector<8x128xf32>, vector<16x128xf32> -> vector<16x128xf32>
    %73 = arith.addf %20, %72 : vector<16x128xf32>
    %74 = vector.extract_strided_slice %56 {offsets = [40, 0], sizes = [8, 128], strides = [1, 1]} : vector<128x128xf32> to vector<8x128xf32>
    %cst_32 = arith.constant dense<0.000000e+00> : vector<16x128xf32>
    %75 = tpu.matmul %58, %74, %cst_32 {dimension_numbers = #tpu.dot_dimension_numbers<[1], [0], [0], [1], [0, 0, 1, 1], [], []>} : vector<16x8xf32>, vector<8x128xf32>, vector<16x128xf32> -> vector<16x128xf32>
    %76 = arith.addf %23, %75 : vector<16x128xf32>
    %77 = vector.extract_strided_slice %56 {offsets = [48, 0], sizes = [8, 128], strides = [1, 1]} : vector<128x128xf32> to vector<8x128xf32>
    %cst_33 = arith.constant dense<0.000000e+00> : vector<16x128xf32>
    %78 = tpu.matmul %58, %77, %cst_33 {dimension_numbers = #tpu.dot_dimension_numbers<[1], [0], [0], [1], [0, 0, 1, 1], [], []>} : vector<16x8xf32>, vector<8x128xf32>, vector<16x128xf32> -> vector<16x128xf32>
    %79 = arith.addf %26, %78 : vector<16x128xf32>
    %80 = vector.extract_strided_slice %56 {offsets = [56, 0], sizes = [8, 128], strides = [1, 1]} : vector<128x128xf32> to vector<8x128xf32>
    %cst_34 = arith.constant dense<0.000000e+00> : vector<16x128xf32>
    %81 = tpu.matmul %58, %80, %cst_34 {dimension_numbers = #tpu.dot_dimension_numbers<[1], [0], [0], [1], [0, 0, 1, 1], [], []>} : vector<16x8xf32>, vector<8x128xf32>, vector<16x128xf32> -> vector<16x128xf32>
    %82 = arith.addf %29, %81 : vector<16x128xf32>
    %83 = vector.extract_strided_slice %56 {offsets = [64, 0], sizes = [8, 128], strides = [1, 1]} : vector<128x128xf32> to vector<8x128xf32>
    %cst_35 = arith.constant dense<0.000000e+00> : vector<16x128xf32>
    %84 = tpu.matmul %58, %83, %cst_35 {dimension_numbers = #tpu.dot_dimension_numbers<[1], [0], [0], [1], [0, 0, 1, 1], [], []>} : vector<16x8xf32>, vector<8x128xf32>, vector<16x128xf32> -> vector<16x128xf32>
    %85 = arith.addf %32, %84 : vector<16x128xf32>
    %86 = vector.extract_strided_slice %56 {offsets = [72, 0], sizes = [8, 128], strides = [1, 1]} : vector<128x128xf32> to vector<8x128xf32>
    %cst_36 = arith.constant dense<0.000000e+00> : vector<16x128xf32>
    %87 = tpu.matmul %58, %86, %cst_36 {dimension_numbers = #tpu.dot_dimension_numbers<[1], [0], [0], [1], [0, 0, 1, 1], [], []>} : vector<16x8xf32>, vector<8x128xf32>, vector<16x128xf32> -> vector<16x128xf32>
    %88 = arith.addf %35, %87 : vector<16x128xf32>
    %89 = vector.extract_strided_slice %56 {offsets = [80, 0], sizes = [8, 128], strides = [1, 1]} : vector<128x128xf32> to vector<8x128xf32>
    %cst_37 = arith.constant dense<0.000000e+00> : vector<16x128xf32>
    %90 = tpu.matmul %58, %89, %cst_37 {dimension_numbers = #tpu.dot_dimension_numbers<[1], [0], [0], [1], [0, 0, 1, 1], [], []>} : vector<16x8xf32>, vector<8x128xf32>, vector<16x128xf32> -> vector<16x128xf32>
    %91 = arith.addf %38, %90 : vector<16x128xf32>
    %92 = vector.extract_strided_slice %56 {offsets = [88, 0], sizes = [8, 128], strides = [1, 1]} : vector<128x128xf32> to vector<8x128xf32>
    %cst_38 = arith.constant dense<0.000000e+00> : vector<16x128xf32>
    %93 = tpu.matmul %58, %92, %cst_38 {dimension_numbers = #tpu.dot_dimension_numbers<[1], [0], [0], [1], [0, 0, 1, 1], [], []>} : vector<16x8xf32>, vector<8x128xf32>, vector<16x128xf32> -> vector<16x128xf32>
    %94 = arith.addf %41, %93 : vector<16x128xf32>
    %95 = vector.extract_strided_slice %56 {offsets = [96, 0], sizes = [8, 128], strides = [1, 1]} : vector<128x128xf32> to vector<8x128xf32>
    %cst_39 = arith.constant dense<0.000000e+00> : vector<16x128xf32>
    %96 = tpu.matmul %58, %95, %cst_39 {dimension_numbers = #tpu.dot_dimension_numbers<[1], [0], [0], [1], [0, 0, 1, 1], [], []>} : vector<16x8xf32>, vector<8x128xf32>, vector<16x128xf32> -> vector<16x128xf32>
    %97 = arith.addf %44, %96 : vector<16x128xf32>
    %98 = vector.extract_strided_slice %56 {offsets = [104, 0], sizes = [8, 128], strides = [1, 1]} : vector<128x128xf32> to vector<8x128xf32>
    %cst_40 = arith.constant dense<0.000000e+00> : vector<16x128xf32>
    %99 = tpu.matmul %58, %98, %cst_40 {dimension_numbers = #tpu.dot_dimension_numbers<[1], [0], [0], [1], [0, 0, 1, 1], [], []>} : vector<16x8xf32>, vector<8x128xf32>, vector<16x128xf32> -> vector<16x128xf32>
    %100 = arith.addf %47, %99 : vector<16x128xf32>
    %101 = vector.extract_strided_slice %56 {offsets = [112, 0], sizes = [8, 128], strides = [1, 1]} : vector<128x128xf32> to vector<8x128xf32>
    %cst_41 = arith.constant dense<0.000000e+00> : vector<16x128xf32>
    %102 = tpu.matmul %58, %101, %cst_41 {dimension_numbers = #tpu.dot_dimension_numbers<[1], [0], [0], [1], [0, 0, 1, 1], [], []>} : vector<16x8xf32>, vector<8x128xf32>, vector<16x128xf32> -> vector<16x128xf32>
    %103 = arith.addf %50, %102 : vector<16x128xf32>
    %104 = vector.extract_strided_slice %56 {offsets = [120, 0], sizes = [8, 128], strides = [1, 1]} : vector<128x128xf32> to vector<8x128xf32>
    %cst_42 = arith.constant dense<0.000000e+00> : vector<16x128xf32>
    %105 = tpu.matmul %58, %104, %cst_42 {dimension_numbers = #tpu.dot_dimension_numbers<[1], [0], [0], [1], [0, 0, 1, 1], [], []>} : vector<16x8xf32>, vector<8x128xf32>, vector<16x128xf32> -> vector<16x128xf32>
    %106 = arith.addf %53, %105 : vector<16x128xf32>
    %cst_43 = arith.constant dense<0.000000e+00> : vector<128x128xf32>
    %107 = tpu.matmul %56, %55, %cst_43 {dimension_numbers = #tpu.dot_dimension_numbers<[1], [0], [0], [1], [0, 0, 1, 1], [], []>} : vector<128x128xf32>, vector<128x128xf32>, vector<128x128xf32> -> vector<128x128xf32>
    %c2 = arith.constant 2 : index
    %c0_44 = arith.constant 0 : index
    %c0_45 = arith.constant 0 : index
    %108 = vector.load %arg4[%c2, %c0_44, %c0_45] : memref<7x16x8xf32, #tpu.memory_space<vmem>>, vector<1x16x8xf32>
    %109 = vector.shape_cast %108 : vector<1x16x8xf32> to vector<16x8xf32>
    %110 = vector.extract_strided_slice %107 {offsets = [0, 0], sizes = [8, 128], strides = [1, 1]} : vector<128x128xf32> to vector<8x128xf32>
    %cst_46 = arith.constant dense<0.000000e+00> : vector<16x128xf32>
    %111 = tpu.matmul %109, %110, %cst_46 {dimension_numbers = #tpu.dot_dimension_numbers<[1], [0], [0], [1], [0, 0, 1, 1], [], []>} : vector<16x8xf32>, vector<8x128xf32>, vector<16x128xf32> -> vector<16x128xf32>
    %112 = arith.addf %61, %111 : vector<16x128xf32>
    %113 = vector.extract_strided_slice %107 {offsets = [8, 0], sizes = [8, 128], strides = [1, 1]} : vector<128x128xf32> to vector<8x128xf32>
    %cst_47 = arith.constant dense<0.000000e+00> : vector<16x128xf32>
    %114 = tpu.matmul %109, %113, %cst_47 {dimension_numbers = #tpu.dot_dimension_numbers<[1], [0], [0], [1], [0, 0, 1, 1], [], []>} : vector<16x8xf32>, vector<8x128xf32>, vector<16x128xf32> -> vector<16x128xf32>
    %115 = arith.addf %64, %114 : vector<16x128xf32>
    %116 = vector.extract_strided_slice %107 {offsets = [16, 0], sizes = [8, 128], strides = [1, 1]} : vector<128x128xf32> to vector<8x128xf32>
    %cst_48 = arith.constant dense<0.000000e+00> : vector<16x128xf32>
    %117 = tpu.matmul %109, %116, %cst_48 {dimension_numbers = #tpu.dot_dimension_numbers<[1], [0], [0], [1], [0, 0, 1, 1], [], []>} : vector<16x8xf32>, vector<8x128xf32>, vector<16x128xf32> -> vector<16x128xf32>
    %118 = arith.addf %67, %117 : vector<16x128xf32>
    %119 = vector.extract_strided_slice %107 {offsets = [24, 0], sizes = [8, 128], strides = [1, 1]} : vector<128x128xf32> to vector<8x128xf32>
    %cst_49 = arith.constant dense<0.000000e+00> : vector<16x128xf32>
    %120 = tpu.matmul %109, %119, %cst_49 {dimension_numbers = #tpu.dot_dimension_numbers<[1], [0], [0], [1], [0, 0, 1, 1], [], []>} : vector<16x8xf32>, vector<8x128xf32>, vector<16x128xf32> -> vector<16x128xf32>
    %121 = arith.addf %70, %120 : vector<16x128xf32>
    %122 = vector.extract_strided_slice %107 {offsets = [32, 0], sizes = [8, 128], strides = [1, 1]} : vector<128x128xf32> to vector<8x128xf32>
    %cst_50 = arith.constant dense<0.000000e+00> : vector<16x128xf32>
    %123 = tpu.matmul %109, %122, %cst_50 {dimension_numbers = #tpu.dot_dimension_numbers<[1], [0], [0], [1], [0, 0, 1, 1], [], []>} : vector<16x8xf32>, vector<8x128xf32>, vector<16x128xf32> -> vector<16x128xf32>
    %124 = arith.addf %73, %123 : vector<16x128xf32>
    %125 = vector.extract_strided_slice %107 {offsets = [40, 0], sizes = [8, 128], strides = [1, 1]} : vector<128x128xf32> to vector<8x128xf32>
    %cst_51 = arith.constant dense<0.000000e+00> : vector<16x128xf32>
    %126 = tpu.matmul %109, %125, %cst_51 {dimension_numbers = #tpu.dot_dimension_numbers<[1], [0], [0], [1], [0, 0, 1, 1], [], []>} : vector<16x8xf32>, vector<8x128xf32>, vector<16x128xf32> -> vector<16x128xf32>
    %127 = arith.addf %76, %126 : vector<16x128xf32>
    %128 = vector.extract_strided_slice %107 {offsets = [48, 0], sizes = [8, 128], strides = [1, 1]} : vector<128x128xf32> to vector<8x128xf32>
    %cst_52 = arith.constant dense<0.000000e+00> : vector<16x128xf32>
    %129 = tpu.matmul %109, %128, %cst_52 {dimension_numbers = #tpu.dot_dimension_numbers<[1], [0], [0], [1], [0, 0, 1, 1], [], []>} : vector<16x8xf32>, vector<8x128xf32>, vector<16x128xf32> -> vector<16x128xf32>
    %130 = arith.addf %79, %129 : vector<16x128xf32>
    %131 = vector.extract_strided_slice %107 {offsets = [56, 0], sizes = [8, 128], strides = [1, 1]} : vector<128x128xf32> to vector<8x128xf32>
    %cst_53 = arith.constant dense<0.000000e+00> : vector<16x128xf32>
    %132 = tpu.matmul %109, %131, %cst_53 {dimension_numbers = #tpu.dot_dimension_numbers<[1], [0], [0], [1], [0, 0, 1, 1], [], []>} : vector<16x8xf32>, vector<8x128xf32>, vector<16x128xf32> -> vector<16x128xf32>
    %133 = arith.addf %82, %132 : vector<16x128xf32>
    %134 = vector.extract_strided_slice %107 {offsets = [64, 0], sizes = [8, 128], strides = [1, 1]} : vector<128x128xf32> to vector<8x128xf32>
    %cst_54 = arith.constant dense<0.000000e+00> : vector<16x128xf32>
    %135 = tpu.matmul %109, %134, %cst_54 {dimension_numbers = #tpu.dot_dimension_numbers<[1], [0], [0], [1], [0, 0, 1, 1], [], []>} : vector<16x8xf32>, vector<8x128xf32>, vector<16x128xf32> -> vector<16x128xf32>
    %136 = arith.addf %85, %135 : vector<16x128xf32>
    %137 = vector.extract_strided_slice %107 {offsets = [72, 0], sizes = [8, 128], strides = [1, 1]} : vector<128x128xf32> to vector<8x128xf32>
    %cst_55 = arith.constant dense<0.000000e+00> : vector<16x128xf32>
    %138 = tpu.matmul %109, %137, %cst_55 {dimension_numbers = #tpu.dot_dimension_numbers<[1], [0], [0], [1], [0, 0, 1, 1], [], []>} : vector<16x8xf32>, vector<8x128xf32>, vector<16x128xf32> -> vector<16x128xf32>
    %139 = arith.addf %88, %138 : vector<16x128xf32>
    %140 = vector.extract_strided_slice %107 {offsets = [80, 0], sizes = [8, 128], strides = [1, 1]} : vector<128x128xf32> to vector<8x128xf32>
    %cst_56 = arith.constant dense<0.000000e+00> : vector<16x128xf32>
    %141 = tpu.matmul %109, %140, %cst_56 {dimension_numbers = #tpu.dot_dimension_numbers<[1], [0], [0], [1], [0, 0, 1, 1], [], []>} : vector<16x8xf32>, vector<8x128xf32>, vector<16x128xf32> -> vector<16x128xf32>
    %142 = arith.addf %91, %141 : vector<16x128xf32>
    %143 = vector.extract_strided_slice %107 {offsets = [88, 0], sizes = [8, 128], strides = [1, 1]} : vector<128x128xf32> to vector<8x128xf32>
    %cst_57 = arith.constant dense<0.000000e+00> : vector<16x128xf32>
    %144 = tpu.matmul %109, %143, %cst_57 {dimension_numbers = #tpu.dot_dimension_numbers<[1], [0], [0], [1], [0, 0, 1, 1], [], []>} : vector<16x8xf32>, vector<8x128xf32>, vector<16x128xf32> -> vector<16x128xf32>
    %145 = arith.addf %94, %144 : vector<16x128xf32>
    %146 = vector.extract_strided_slice %107 {offsets = [96, 0], sizes = [8, 128], strides = [1, 1]} : vector<128x128xf32> to vector<8x128xf32>
    %cst_58 = arith.constant dense<0.000000e+00> : vector<16x128xf32>
    %147 = tpu.matmul %109, %146, %cst_58 {dimension_numbers = #tpu.dot_dimension_numbers<[1], [0], [0], [1], [0, 0, 1, 1], [], []>} : vector<16x8xf32>, vector<8x128xf32>, vector<16x128xf32> -> vector<16x128xf32>
    %148 = arith.addf %97, %147 : vector<16x128xf32>
    %149 = vector.extract_strided_slice %107 {offsets = [104, 0], sizes = [8, 128], strides = [1, 1]} : vector<128x128xf32> to vector<8x128xf32>
    %cst_59 = arith.constant dense<0.000000e+00> : vector<16x128xf32>
    %150 = tpu.matmul %109, %149, %cst_59 {dimension_numbers = #tpu.dot_dimension_numbers<[1], [0], [0], [1], [0, 0, 1, 1], [], []>} : vector<16x8xf32>, vector<8x128xf32>, vector<16x128xf32> -> vector<16x128xf32>
    %151 = arith.addf %100, %150 : vector<16x128xf32>
    %152 = vector.extract_strided_slice %107 {offsets = [112, 0], sizes = [8, 128], strides = [1, 1]} : vector<128x128xf32> to vector<8x128xf32>
    %cst_60 = arith.constant dense<0.000000e+00> : vector<16x128xf32>
    %153 = tpu.matmul %109, %152, %cst_60 {dimension_numbers = #tpu.dot_dimension_numbers<[1], [0], [0], [1], [0, 0, 1, 1], [], []>} : vector<16x8xf32>, vector<8x128xf32>, vector<16x128xf32> -> vector<16x128xf32>
    %154 = arith.addf %103, %153 : vector<16x128xf32>
    %155 = vector.extract_strided_slice %107 {offsets = [120, 0], sizes = [8, 128], strides = [1, 1]} : vector<128x128xf32> to vector<8x128xf32>
    %cst_61 = arith.constant dense<0.000000e+00> : vector<16x128xf32>
    %156 = tpu.matmul %109, %155, %cst_61 {dimension_numbers = #tpu.dot_dimension_numbers<[1], [0], [0], [1], [0, 0, 1, 1], [], []>} : vector<16x8xf32>, vector<8x128xf32>, vector<16x128xf32> -> vector<16x128xf32>
    %157 = arith.addf %106, %156 : vector<16x128xf32>
    %c1_62 = arith.constant 1 : index
    %c0_63 = arith.constant 0 : index
    %c0_64 = arith.constant 0 : index
    %158 = vector.load %arg3[%c1_62, %c0_63, %c0_64] : memref<3x128x128xf32, #tpu.memory_space<vmem>>, vector<1x128x128xf32>
    %159 = vector.shape_cast %158 : vector<1x128x128xf32> to vector<128x128xf32>
    %cst_65 = arith.constant dense<0.000000e+00> : vector<128x128xf32>
    %160 = tpu.matmul %0, %159, %cst_65 {dimension_numbers = #tpu.dot_dimension_numbers<[1], [0], [0], [1], [0, 0, 1, 1], [], []>} : vector<128x128xf32>, vector<128x128xf32>, vector<128x128xf32> -> vector<128x128xf32>
    %c3 = arith.constant 3 : index
    %c0_66 = arith.constant 0 : index
    %c0_67 = arith.constant 0 : index
    %161 = vector.load %arg4[%c3, %c0_66, %c0_67] : memref<7x16x8xf32, #tpu.memory_space<vmem>>, vector<1x16x8xf32>
    %162 = vector.shape_cast %161 : vector<1x16x8xf32> to vector<16x8xf32>
    %163 = vector.extract_strided_slice %160 {offsets = [0, 0], sizes = [8, 128], strides = [1, 1]} : vector<128x128xf32> to vector<8x128xf32>
    %cst_68 = arith.constant dense<0.000000e+00> : vector<16x128xf32>
    %164 = tpu.matmul %162, %163, %cst_68 {dimension_numbers = #tpu.dot_dimension_numbers<[1], [0], [0], [1], [0, 0, 1, 1], [], []>} : vector<16x8xf32>, vector<8x128xf32>, vector<16x128xf32> -> vector<16x128xf32>
    %165 = arith.addf %112, %164 : vector<16x128xf32>
    %166 = vector.extract_strided_slice %160 {offsets = [8, 0], sizes = [8, 128], strides = [1, 1]} : vector<128x128xf32> to vector<8x128xf32>
    %cst_69 = arith.constant dense<0.000000e+00> : vector<16x128xf32>
    %167 = tpu.matmul %162, %166, %cst_69 {dimension_numbers = #tpu.dot_dimension_numbers<[1], [0], [0], [1], [0, 0, 1, 1], [], []>} : vector<16x8xf32>, vector<8x128xf32>, vector<16x128xf32> -> vector<16x128xf32>
    %168 = arith.addf %115, %167 : vector<16x128xf32>
    %169 = vector.extract_strided_slice %160 {offsets = [16, 0], sizes = [8, 128], strides = [1, 1]} : vector<128x128xf32> to vector<8x128xf32>
    %cst_70 = arith.constant dense<0.000000e+00> : vector<16x128xf32>
    %170 = tpu.matmul %162, %169, %cst_70 {dimension_numbers = #tpu.dot_dimension_numbers<[1], [0], [0], [1], [0, 0, 1, 1], [], []>} : vector<16x8xf32>, vector<8x128xf32>, vector<16x128xf32> -> vector<16x128xf32>
    %171 = arith.addf %118, %170 : vector<16x128xf32>
    %172 = vector.extract_strided_slice %160 {offsets = [24, 0], sizes = [8, 128], strides = [1, 1]} : vector<128x128xf32> to vector<8x128xf32>
    %cst_71 = arith.constant dense<0.000000e+00> : vector<16x128xf32>
    %173 = tpu.matmul %162, %172, %cst_71 {dimension_numbers = #tpu.dot_dimension_numbers<[1], [0], [0], [1], [0, 0, 1, 1], [], []>} : vector<16x8xf32>, vector<8x128xf32>, vector<16x128xf32> -> vector<16x128xf32>
    %174 = arith.addf %121, %173 : vector<16x128xf32>
    %175 = vector.extract_strided_slice %160 {offsets = [32, 0], sizes = [8, 128], strides = [1, 1]} : vector<128x128xf32> to vector<8x128xf32>
    %cst_72 = arith.constant dense<0.000000e+00> : vector<16x128xf32>
    %176 = tpu.matmul %162, %175, %cst_72 {dimension_numbers = #tpu.dot_dimension_numbers<[1], [0], [0], [1], [0, 0, 1, 1], [], []>} : vector<16x8xf32>, vector<8x128xf32>, vector<16x128xf32> -> vector<16x128xf32>
    %177 = arith.addf %124, %176 : vector<16x128xf32>
    %178 = vector.extract_strided_slice %160 {offsets = [40, 0], sizes = [8, 128], strides = [1, 1]} : vector<128x128xf32> to vector<8x128xf32>
    %cst_73 = arith.constant dense<0.000000e+00> : vector<16x128xf32>
    %179 = tpu.matmul %162, %178, %cst_73 {dimension_numbers = #tpu.dot_dimension_numbers<[1], [0], [0], [1], [0, 0, 1, 1], [], []>} : vector<16x8xf32>, vector<8x128xf32>, vector<16x128xf32> -> vector<16x128xf32>
    %180 = arith.addf %127, %179 : vector<16x128xf32>
    %181 = vector.extract_strided_slice %160 {offsets = [48, 0], sizes = [8, 128], strides = [1, 1]} : vector<128x128xf32> to vector<8x128xf32>
    %cst_74 = arith.constant dense<0.000000e+00> : vector<16x128xf32>
    %182 = tpu.matmul %162, %181, %cst_74 {dimension_numbers = #tpu.dot_dimension_numbers<[1], [0], [0], [1], [0, 0, 1, 1], [], []>} : vector<16x8xf32>, vector<8x128xf32>, vector<16x128xf32> -> vector<16x128xf32>
    %183 = arith.addf %130, %182 : vector<16x128xf32>
    %184 = vector.extract_strided_slice %160 {offsets = [56, 0], sizes = [8, 128], strides = [1, 1]} : vector<128x128xf32> to vector<8x128xf32>
    %cst_75 = arith.constant dense<0.000000e+00> : vector<16x128xf32>
    %185 = tpu.matmul %162, %184, %cst_75 {dimension_numbers = #tpu.dot_dimension_numbers<[1], [0], [0], [1], [0, 0, 1, 1], [], []>} : vector<16x8xf32>, vector<8x128xf32>, vector<16x128xf32> -> vector<16x128xf32>
    %186 = arith.addf %133, %185 : vector<16x128xf32>
    %187 = vector.extract_strided_slice %160 {offsets = [64, 0], sizes = [8, 128], strides = [1, 1]} : vector<128x128xf32> to vector<8x128xf32>
    %cst_76 = arith.constant dense<0.000000e+00> : vector<16x128xf32>
    %188 = tpu.matmul %162, %187, %cst_76 {dimension_numbers = #tpu.dot_dimension_numbers<[1], [0], [0], [1], [0, 0, 1, 1], [], []>} : vector<16x8xf32>, vector<8x128xf32>, vector<16x128xf32> -> vector<16x128xf32>
    %189 = arith.addf %136, %188 : vector<16x128xf32>
    %190 = vector.extract_strided_slice %160 {offsets = [72, 0], sizes = [8, 128], strides = [1, 1]} : vector<128x128xf32> to vector<8x128xf32>
    %cst_77 = arith.constant dense<0.000000e+00> : vector<16x128xf32>
    %191 = tpu.matmul %162, %190, %cst_77 {dimension_numbers = #tpu.dot_dimension_numbers<[1], [0], [0], [1], [0, 0, 1, 1], [], []>} : vector<16x8xf32>, vector<8x128xf32>, vector<16x128xf32> -> vector<16x128xf32>
    %192 = arith.addf %139, %191 : vector<16x128xf32>
    %193 = vector.extract_strided_slice %160 {offsets = [80, 0], sizes = [8, 128], strides = [1, 1]} : vector<128x128xf32> to vector<8x128xf32>
    %cst_78 = arith.constant dense<0.000000e+00> : vector<16x128xf32>
    %194 = tpu.matmul %162, %193, %cst_78 {dimension_numbers = #tpu.dot_dimension_numbers<[1], [0], [0], [1], [0, 0, 1, 1], [], []>} : vector<16x8xf32>, vector<8x128xf32>, vector<16x128xf32> -> vector<16x128xf32>
    %195 = arith.addf %142, %194 : vector<16x128xf32>
    %196 = vector.extract_strided_slice %160 {offsets = [88, 0], sizes = [8, 128], strides = [1, 1]} : vector<128x128xf32> to vector<8x128xf32>
    %cst_79 = arith.constant dense<0.000000e+00> : vector<16x128xf32>
    %197 = tpu.matmul %162, %196, %cst_79 {dimension_numbers = #tpu.dot_dimension_numbers<[1], [0], [0], [1], [0, 0, 1, 1], [], []>} : vector<16x8xf32>, vector<8x128xf32>, vector<16x128xf32> -> vector<16x128xf32>
    %198 = arith.addf %145, %197 : vector<16x128xf32>
    %199 = vector.extract_strided_slice %160 {offsets = [96, 0], sizes = [8, 128], strides = [1, 1]} : vector<128x128xf32> to vector<8x128xf32>
    %cst_80 = arith.constant dense<0.000000e+00> : vector<16x128xf32>
    %200 = tpu.matmul %162, %199, %cst_80 {dimension_numbers = #tpu.dot_dimension_numbers<[1], [0], [0], [1], [0, 0, 1, 1], [], []>} : vector<16x8xf32>, vector<8x128xf32>, vector<16x128xf32> -> vector<16x128xf32>
    %201 = arith.addf %148, %200 : vector<16x128xf32>
    %202 = vector.extract_strided_slice %160 {offsets = [104, 0], sizes = [8, 128], strides = [1, 1]} : vector<128x128xf32> to vector<8x128xf32>
    %cst_81 = arith.constant dense<0.000000e+00> : vector<16x128xf32>
    %203 = tpu.matmul %162, %202, %cst_81 {dimension_numbers = #tpu.dot_dimension_numbers<[1], [0], [0], [1], [0, 0, 1, 1], [], []>} : vector<16x8xf32>, vector<8x128xf32>, vector<16x128xf32> -> vector<16x128xf32>
    %204 = arith.addf %151, %203 : vector<16x128xf32>
    %205 = vector.extract_strided_slice %160 {offsets = [112, 0], sizes = [8, 128], strides = [1, 1]} : vector<128x128xf32> to vector<8x128xf32>
    %cst_82 = arith.constant dense<0.000000e+00> : vector<16x128xf32>
    %206 = tpu.matmul %162, %205, %cst_82 {dimension_numbers = #tpu.dot_dimension_numbers<[1], [0], [0], [1], [0, 0, 1, 1], [], []>} : vector<16x8xf32>, vector<8x128xf32>, vector<16x128xf32> -> vector<16x128xf32>
    %207 = arith.addf %154, %206 : vector<16x128xf32>
    %208 = vector.extract_strided_slice %160 {offsets = [120, 0], sizes = [8, 128], strides = [1, 1]} : vector<128x128xf32> to vector<8x128xf32>
    %cst_83 = arith.constant dense<0.000000e+00> : vector<16x128xf32>
    %209 = tpu.matmul %162, %208, %cst_83 {dimension_numbers = #tpu.dot_dimension_numbers<[1], [0], [0], [1], [0, 0, 1, 1], [], []>} : vector<16x8xf32>, vector<8x128xf32>, vector<16x128xf32> -> vector<16x128xf32>
    %210 = arith.addf %157, %209 : vector<16x128xf32>
    %cst_84 = arith.constant dense<0.000000e+00> : vector<128x128xf32>
    %211 = tpu.matmul %160, %159, %cst_84 {dimension_numbers = #tpu.dot_dimension_numbers<[1], [0], [0], [1], [0, 0, 1, 1], [], []>} : vector<128x128xf32>, vector<128x128xf32>, vector<128x128xf32> -> vector<128x128xf32>
    %c4 = arith.constant 4 : index
    %c0_85 = arith.constant 0 : index
    %c0_86 = arith.constant 0 : index
    %212 = vector.load %arg4[%c4, %c0_85, %c0_86] : memref<7x16x8xf32, #tpu.memory_space<vmem>>, vector<1x16x8xf32>
    %213 = vector.shape_cast %212 : vector<1x16x8xf32> to vector<16x8xf32>
    %214 = vector.extract_strided_slice %211 {offsets = [0, 0], sizes = [8, 128], strides = [1, 1]} : vector<128x128xf32> to vector<8x128xf32>
    %cst_87 = arith.constant dense<0.000000e+00> : vector<16x128xf32>
    %215 = tpu.matmul %213, %214, %cst_87 {dimension_numbers = #tpu.dot_dimension_numbers<[1], [0], [0], [1], [0, 0, 1, 1], [], []>} : vector<16x8xf32>, vector<8x128xf32>, vector<16x128xf32> -> vector<16x128xf32>
    %216 = arith.addf %165, %215 : vector<16x128xf32>
    %217 = vector.extract_strided_slice %211 {offsets = [8, 0], sizes = [8, 128], strides = [1, 1]} : vector<128x128xf32> to vector<8x128xf32>
    %cst_88 = arith.constant dense<0.000000e+00> : vector<16x128xf32>
    %218 = tpu.matmul %213, %217, %cst_88 {dimension_numbers = #tpu.dot_dimension_numbers<[1], [0], [0], [1], [0, 0, 1, 1], [], []>} : vector<16x8xf32>, vector<8x128xf32>, vector<16x128xf32> -> vector<16x128xf32>
    %219 = arith.addf %168, %218 : vector<16x128xf32>
    %220 = vector.extract_strided_slice %211 {offsets = [16, 0], sizes = [8, 128], strides = [1, 1]} : vector<128x128xf32> to vector<8x128xf32>
    %cst_89 = arith.constant dense<0.000000e+00> : vector<16x128xf32>
    %221 = tpu.matmul %213, %220, %cst_89 {dimension_numbers = #tpu.dot_dimension_numbers<[1], [0], [0], [1], [0, 0, 1, 1], [], []>} : vector<16x8xf32>, vector<8x128xf32>, vector<16x128xf32> -> vector<16x128xf32>
    %222 = arith.addf %171, %221 : vector<16x128xf32>
    %223 = vector.extract_strided_slice %211 {offsets = [24, 0], sizes = [8, 128], strides = [1, 1]} : vector<128x128xf32> to vector<8x128xf32>
    %cst_90 = arith.constant dense<0.000000e+00> : vector<16x128xf32>
    %224 = tpu.matmul %213, %223, %cst_90 {dimension_numbers = #tpu.dot_dimension_numbers<[1], [0], [0], [1], [0, 0, 1, 1], [], []>} : vector<16x8xf32>, vector<8x128xf32>, vector<16x128xf32> -> vector<16x128xf32>
    %225 = arith.addf %174, %224 : vector<16x128xf32>
    %226 = vector.extract_strided_slice %211 {offsets = [32, 0], sizes = [8, 128], strides = [1, 1]} : vector<128x128xf32> to vector<8x128xf32>
    %cst_91 = arith.constant dense<0.000000e+00> : vector<16x128xf32>
    %227 = tpu.matmul %213, %226, %cst_91 {dimension_numbers = #tpu.dot_dimension_numbers<[1], [0], [0], [1], [0, 0, 1, 1], [], []>} : vector<16x8xf32>, vector<8x128xf32>, vector<16x128xf32> -> vector<16x128xf32>
    %228 = arith.addf %177, %227 : vector<16x128xf32>
    %229 = vector.extract_strided_slice %211 {offsets = [40, 0], sizes = [8, 128], strides = [1, 1]} : vector<128x128xf32> to vector<8x128xf32>
    %cst_92 = arith.constant dense<0.000000e+00> : vector<16x128xf32>
    %230 = tpu.matmul %213, %229, %cst_92 {dimension_numbers = #tpu.dot_dimension_numbers<[1], [0], [0], [1], [0, 0, 1, 1], [], []>} : vector<16x8xf32>, vector<8x128xf32>, vector<16x128xf32> -> vector<16x128xf32>
    %231 = arith.addf %180, %230 : vector<16x128xf32>
    %232 = vector.extract_strided_slice %211 {offsets = [48, 0], sizes = [8, 128], strides = [1, 1]} : vector<128x128xf32> to vector<8x128xf32>
    %cst_93 = arith.constant dense<0.000000e+00> : vector<16x128xf32>
    %233 = tpu.matmul %213, %232, %cst_93 {dimension_numbers = #tpu.dot_dimension_numbers<[1], [0], [0], [1], [0, 0, 1, 1], [], []>} : vector<16x8xf32>, vector<8x128xf32>, vector<16x128xf32> -> vector<16x128xf32>
    %234 = arith.addf %183, %233 : vector<16x128xf32>
    %235 = vector.extract_strided_slice %211 {offsets = [56, 0], sizes = [8, 128], strides = [1, 1]} : vector<128x128xf32> to vector<8x128xf32>
    %cst_94 = arith.constant dense<0.000000e+00> : vector<16x128xf32>
    %236 = tpu.matmul %213, %235, %cst_94 {dimension_numbers = #tpu.dot_dimension_numbers<[1], [0], [0], [1], [0, 0, 1, 1], [], []>} : vector<16x8xf32>, vector<8x128xf32>, vector<16x128xf32> -> vector<16x128xf32>
    %237 = arith.addf %186, %236 : vector<16x128xf32>
    %238 = vector.extract_strided_slice %211 {offsets = [64, 0], sizes = [8, 128], strides = [1, 1]} : vector<128x128xf32> to vector<8x128xf32>
    %cst_95 = arith.constant dense<0.000000e+00> : vector<16x128xf32>
    %239 = tpu.matmul %213, %238, %cst_95 {dimension_numbers = #tpu.dot_dimension_numbers<[1], [0], [0], [1], [0, 0, 1, 1], [], []>} : vector<16x8xf32>, vector<8x128xf32>, vector<16x128xf32> -> vector<16x128xf32>
    %240 = arith.addf %189, %239 : vector<16x128xf32>
    %241 = vector.extract_strided_slice %211 {offsets = [72, 0], sizes = [8, 128], strides = [1, 1]} : vector<128x128xf32> to vector<8x128xf32>
    %cst_96 = arith.constant dense<0.000000e+00> : vector<16x128xf32>
    %242 = tpu.matmul %213, %241, %cst_96 {dimension_numbers = #tpu.dot_dimension_numbers<[1], [0], [0], [1], [0, 0, 1, 1], [], []>} : vector<16x8xf32>, vector<8x128xf32>, vector<16x128xf32> -> vector<16x128xf32>
    %243 = arith.addf %192, %242 : vector<16x128xf32>
    %244 = vector.extract_strided_slice %211 {offsets = [80, 0], sizes = [8, 128], strides = [1, 1]} : vector<128x128xf32> to vector<8x128xf32>
    %cst_97 = arith.constant dense<0.000000e+00> : vector<16x128xf32>
    %245 = tpu.matmul %213, %244, %cst_97 {dimension_numbers = #tpu.dot_dimension_numbers<[1], [0], [0], [1], [0, 0, 1, 1], [], []>} : vector<16x8xf32>, vector<8x128xf32>, vector<16x128xf32> -> vector<16x128xf32>
    %246 = arith.addf %195, %245 : vector<16x128xf32>
    %247 = vector.extract_strided_slice %211 {offsets = [88, 0], sizes = [8, 128], strides = [1, 1]} : vector<128x128xf32> to vector<8x128xf32>
    %cst_98 = arith.constant dense<0.000000e+00> : vector<16x128xf32>
    %248 = tpu.matmul %213, %247, %cst_98 {dimension_numbers = #tpu.dot_dimension_numbers<[1], [0], [0], [1], [0, 0, 1, 1], [], []>} : vector<16x8xf32>, vector<8x128xf32>, vector<16x128xf32> -> vector<16x128xf32>
    %249 = arith.addf %198, %248 : vector<16x128xf32>
    %250 = vector.extract_strided_slice %211 {offsets = [96, 0], sizes = [8, 128], strides = [1, 1]} : vector<128x128xf32> to vector<8x128xf32>
    %cst_99 = arith.constant dense<0.000000e+00> : vector<16x128xf32>
    %251 = tpu.matmul %213, %250, %cst_99 {dimension_numbers = #tpu.dot_dimension_numbers<[1], [0], [0], [1], [0, 0, 1, 1], [], []>} : vector<16x8xf32>, vector<8x128xf32>, vector<16x128xf32> -> vector<16x128xf32>
    %252 = arith.addf %201, %251 : vector<16x128xf32>
    %253 = vector.extract_strided_slice %211 {offsets = [104, 0], sizes = [8, 128], strides = [1, 1]} : vector<128x128xf32> to vector<8x128xf32>
    %cst_100 = arith.constant dense<0.000000e+00> : vector<16x128xf32>
    %254 = tpu.matmul %213, %253, %cst_100 {dimension_numbers = #tpu.dot_dimension_numbers<[1], [0], [0], [1], [0, 0, 1, 1], [], []>} : vector<16x8xf32>, vector<8x128xf32>, vector<16x128xf32> -> vector<16x128xf32>
    %255 = arith.addf %204, %254 : vector<16x128xf32>
    %256 = vector.extract_strided_slice %211 {offsets = [112, 0], sizes = [8, 128], strides = [1, 1]} : vector<128x128xf32> to vector<8x128xf32>
    %cst_101 = arith.constant dense<0.000000e+00> : vector<16x128xf32>
    %257 = tpu.matmul %213, %256, %cst_101 {dimension_numbers = #tpu.dot_dimension_numbers<[1], [0], [0], [1], [0, 0, 1, 1], [], []>} : vector<16x8xf32>, vector<8x128xf32>, vector<16x128xf32> -> vector<16x128xf32>
    %258 = arith.addf %207, %257 : vector<16x128xf32>
    %259 = vector.extract_strided_slice %211 {offsets = [120, 0], sizes = [8, 128], strides = [1, 1]} : vector<128x128xf32> to vector<8x128xf32>
    %cst_102 = arith.constant dense<0.000000e+00> : vector<16x128xf32>
    %260 = tpu.matmul %213, %259, %cst_102 {dimension_numbers = #tpu.dot_dimension_numbers<[1], [0], [0], [1], [0, 0, 1, 1], [], []>} : vector<16x8xf32>, vector<8x128xf32>, vector<16x128xf32> -> vector<16x128xf32>
    %261 = arith.addf %210, %260 : vector<16x128xf32>
    %c2_103 = arith.constant 2 : index
    %c0_104 = arith.constant 0 : index
    %c0_105 = arith.constant 0 : index
    %262 = vector.load %arg3[%c2_103, %c0_104, %c0_105] : memref<3x128x128xf32, #tpu.memory_space<vmem>>, vector<1x128x128xf32>
    %263 = vector.shape_cast %262 : vector<1x128x128xf32> to vector<128x128xf32>
    %cst_106 = arith.constant dense<0.000000e+00> : vector<128x128xf32>
    %264 = tpu.matmul %0, %263, %cst_106 {dimension_numbers = #tpu.dot_dimension_numbers<[1], [0], [0], [1], [0, 0, 1, 1], [], []>} : vector<128x128xf32>, vector<128x128xf32>, vector<128x128xf32> -> vector<128x128xf32>
    %c5 = arith.constant 5 : index
    %c0_107 = arith.constant 0 : index
    %c0_108 = arith.constant 0 : index
    %265 = vector.load %arg4[%c5, %c0_107, %c0_108] : memref<7x16x8xf32, #tpu.memory_space<vmem>>, vector<1x16x8xf32>
    %266 = vector.shape_cast %265 : vector<1x16x8xf32> to vector<16x8xf32>
    %267 = vector.extract_strided_slice %264 {offsets = [0, 0], sizes = [8, 128], strides = [1, 1]} : vector<128x128xf32> to vector<8x128xf32>
    %cst_109 = arith.constant dense<0.000000e+00> : vector<16x128xf32>
    %268 = tpu.matmul %266, %267, %cst_109 {dimension_numbers = #tpu.dot_dimension_numbers<[1], [0], [0], [1], [0, 0, 1, 1], [], []>} : vector<16x8xf32>, vector<8x128xf32>, vector<16x128xf32> -> vector<16x128xf32>
    %269 = arith.addf %216, %268 : vector<16x128xf32>
    %270 = vector.extract_strided_slice %264 {offsets = [8, 0], sizes = [8, 128], strides = [1, 1]} : vector<128x128xf32> to vector<8x128xf32>
    %cst_110 = arith.constant dense<0.000000e+00> : vector<16x128xf32>
    %271 = tpu.matmul %266, %270, %cst_110 {dimension_numbers = #tpu.dot_dimension_numbers<[1], [0], [0], [1], [0, 0, 1, 1], [], []>} : vector<16x8xf32>, vector<8x128xf32>, vector<16x128xf32> -> vector<16x128xf32>
    %272 = arith.addf %219, %271 : vector<16x128xf32>
    %273 = vector.extract_strided_slice %264 {offsets = [16, 0], sizes = [8, 128], strides = [1, 1]} : vector<128x128xf32> to vector<8x128xf32>
    %cst_111 = arith.constant dense<0.000000e+00> : vector<16x128xf32>
    %274 = tpu.matmul %266, %273, %cst_111 {dimension_numbers = #tpu.dot_dimension_numbers<[1], [0], [0], [1], [0, 0, 1, 1], [], []>} : vector<16x8xf32>, vector<8x128xf32>, vector<16x128xf32> -> vector<16x128xf32>
    %275 = arith.addf %222, %274 : vector<16x128xf32>
    %276 = vector.extract_strided_slice %264 {offsets = [24, 0], sizes = [8, 128], strides = [1, 1]} : vector<128x128xf32> to vector<8x128xf32>
    %cst_112 = arith.constant dense<0.000000e+00> : vector<16x128xf32>
    %277 = tpu.matmul %266, %276, %cst_112 {dimension_numbers = #tpu.dot_dimension_numbers<[1], [0], [0], [1], [0, 0, 1, 1], [], []>} : vector<16x8xf32>, vector<8x128xf32>, vector<16x128xf32> -> vector<16x128xf32>
    %278 = arith.addf %225, %277 : vector<16x128xf32>
    %279 = vector.extract_strided_slice %264 {offsets = [32, 0], sizes = [8, 128], strides = [1, 1]} : vector<128x128xf32> to vector<8x128xf32>
    %cst_113 = arith.constant dense<0.000000e+00> : vector<16x128xf32>
    %280 = tpu.matmul %266, %279, %cst_113 {dimension_numbers = #tpu.dot_dimension_numbers<[1], [0], [0], [1], [0, 0, 1, 1], [], []>} : vector<16x8xf32>, vector<8x128xf32>, vector<16x128xf32> -> vector<16x128xf32>
    %281 = arith.addf %228, %280 : vector<16x128xf32>
    %282 = vector.extract_strided_slice %264 {offsets = [40, 0], sizes = [8, 128], strides = [1, 1]} : vector<128x128xf32> to vector<8x128xf32>
    %cst_114 = arith.constant dense<0.000000e+00> : vector<16x128xf32>
    %283 = tpu.matmul %266, %282, %cst_114 {dimension_numbers = #tpu.dot_dimension_numbers<[1], [0], [0], [1], [0, 0, 1, 1], [], []>} : vector<16x8xf32>, vector<8x128xf32>, vector<16x128xf32> -> vector<16x128xf32>
    %284 = arith.addf %231, %283 : vector<16x128xf32>
    %285 = vector.extract_strided_slice %264 {offsets = [48, 0], sizes = [8, 128], strides = [1, 1]} : vector<128x128xf32> to vector<8x128xf32>
    %cst_115 = arith.constant dense<0.000000e+00> : vector<16x128xf32>
    %286 = tpu.matmul %266, %285, %cst_115 {dimension_numbers = #tpu.dot_dimension_numbers<[1], [0], [0], [1], [0, 0, 1, 1], [], []>} : vector<16x8xf32>, vector<8x128xf32>, vector<16x128xf32> -> vector<16x128xf32>
    %287 = arith.addf %234, %286 : vector<16x128xf32>
    %288 = vector.extract_strided_slice %264 {offsets = [56, 0], sizes = [8, 128], strides = [1, 1]} : vector<128x128xf32> to vector<8x128xf32>
    %cst_116 = arith.constant dense<0.000000e+00> : vector<16x128xf32>
    %289 = tpu.matmul %266, %288, %cst_116 {dimension_numbers = #tpu.dot_dimension_numbers<[1], [0], [0], [1], [0, 0, 1, 1], [], []>} : vector<16x8xf32>, vector<8x128xf32>, vector<16x128xf32> -> vector<16x128xf32>
    %290 = arith.addf %237, %289 : vector<16x128xf32>
    %291 = vector.extract_strided_slice %264 {offsets = [64, 0], sizes = [8, 128], strides = [1, 1]} : vector<128x128xf32> to vector<8x128xf32>
    %cst_117 = arith.constant dense<0.000000e+00> : vector<16x128xf32>
    %292 = tpu.matmul %266, %291, %cst_117 {dimension_numbers = #tpu.dot_dimension_numbers<[1], [0], [0], [1], [0, 0, 1, 1], [], []>} : vector<16x8xf32>, vector<8x128xf32>, vector<16x128xf32> -> vector<16x128xf32>
    %293 = arith.addf %240, %292 : vector<16x128xf32>
    %294 = vector.extract_strided_slice %264 {offsets = [72, 0], sizes = [8, 128], strides = [1, 1]} : vector<128x128xf32> to vector<8x128xf32>
    %cst_118 = arith.constant dense<0.000000e+00> : vector<16x128xf32>
    %295 = tpu.matmul %266, %294, %cst_118 {dimension_numbers = #tpu.dot_dimension_numbers<[1], [0], [0], [1], [0, 0, 1, 1], [], []>} : vector<16x8xf32>, vector<8x128xf32>, vector<16x128xf32> -> vector<16x128xf32>
    %296 = arith.addf %243, %295 : vector<16x128xf32>
    %297 = vector.extract_strided_slice %264 {offsets = [80, 0], sizes = [8, 128], strides = [1, 1]} : vector<128x128xf32> to vector<8x128xf32>
    %cst_119 = arith.constant dense<0.000000e+00> : vector<16x128xf32>
    %298 = tpu.matmul %266, %297, %cst_119 {dimension_numbers = #tpu.dot_dimension_numbers<[1], [0], [0], [1], [0, 0, 1, 1], [], []>} : vector<16x8xf32>, vector<8x128xf32>, vector<16x128xf32> -> vector<16x128xf32>
    %299 = arith.addf %246, %298 : vector<16x128xf32>
    %300 = vector.extract_strided_slice %264 {offsets = [88, 0], sizes = [8, 128], strides = [1, 1]} : vector<128x128xf32> to vector<8x128xf32>
    %cst_120 = arith.constant dense<0.000000e+00> : vector<16x128xf32>
    %301 = tpu.matmul %266, %300, %cst_120 {dimension_numbers = #tpu.dot_dimension_numbers<[1], [0], [0], [1], [0, 0, 1, 1], [], []>} : vector<16x8xf32>, vector<8x128xf32>, vector<16x128xf32> -> vector<16x128xf32>
    %302 = arith.addf %249, %301 : vector<16x128xf32>
    %303 = vector.extract_strided_slice %264 {offsets = [96, 0], sizes = [8, 128], strides = [1, 1]} : vector<128x128xf32> to vector<8x128xf32>
    %cst_121 = arith.constant dense<0.000000e+00> : vector<16x128xf32>
    %304 = tpu.matmul %266, %303, %cst_121 {dimension_numbers = #tpu.dot_dimension_numbers<[1], [0], [0], [1], [0, 0, 1, 1], [], []>} : vector<16x8xf32>, vector<8x128xf32>, vector<16x128xf32> -> vector<16x128xf32>
    %305 = arith.addf %252, %304 : vector<16x128xf32>
    %306 = vector.extract_strided_slice %264 {offsets = [104, 0], sizes = [8, 128], strides = [1, 1]} : vector<128x128xf32> to vector<8x128xf32>
    %cst_122 = arith.constant dense<0.000000e+00> : vector<16x128xf32>
    %307 = tpu.matmul %266, %306, %cst_122 {dimension_numbers = #tpu.dot_dimension_numbers<[1], [0], [0], [1], [0, 0, 1, 1], [], []>} : vector<16x8xf32>, vector<8x128xf32>, vector<16x128xf32> -> vector<16x128xf32>
    %308 = arith.addf %255, %307 : vector<16x128xf32>
    %309 = vector.extract_strided_slice %264 {offsets = [112, 0], sizes = [8, 128], strides = [1, 1]} : vector<128x128xf32> to vector<8x128xf32>
    %cst_123 = arith.constant dense<0.000000e+00> : vector<16x128xf32>
    %310 = tpu.matmul %266, %309, %cst_123 {dimension_numbers = #tpu.dot_dimension_numbers<[1], [0], [0], [1], [0, 0, 1, 1], [], []>} : vector<16x8xf32>, vector<8x128xf32>, vector<16x128xf32> -> vector<16x128xf32>
    %311 = arith.addf %258, %310 : vector<16x128xf32>
    %312 = vector.extract_strided_slice %264 {offsets = [120, 0], sizes = [8, 128], strides = [1, 1]} : vector<128x128xf32> to vector<8x128xf32>
    %cst_124 = arith.constant dense<0.000000e+00> : vector<16x128xf32>
    %313 = tpu.matmul %266, %312, %cst_124 {dimension_numbers = #tpu.dot_dimension_numbers<[1], [0], [0], [1], [0, 0, 1, 1], [], []>} : vector<16x8xf32>, vector<8x128xf32>, vector<16x128xf32> -> vector<16x128xf32>
    %314 = arith.addf %261, %313 : vector<16x128xf32>
    %cst_125 = arith.constant dense<0.000000e+00> : vector<128x128xf32>
    %315 = tpu.matmul %264, %263, %cst_125 {dimension_numbers = #tpu.dot_dimension_numbers<[1], [0], [0], [1], [0, 0, 1, 1], [], []>} : vector<128x128xf32>, vector<128x128xf32>, vector<128x128xf32> -> vector<128x128xf32>
    %c6 = arith.constant 6 : index
    %c0_126 = arith.constant 0 : index
    %c0_127 = arith.constant 0 : index
    %316 = vector.load %arg4[%c6, %c0_126, %c0_127] : memref<7x16x8xf32, #tpu.memory_space<vmem>>, vector<1x16x8xf32>
    %317 = vector.shape_cast %316 : vector<1x16x8xf32> to vector<16x8xf32>
    %318 = vector.extract_strided_slice %315 {offsets = [0, 0], sizes = [8, 128], strides = [1, 1]} : vector<128x128xf32> to vector<8x128xf32>
    %cst_128 = arith.constant dense<0.000000e+00> : vector<16x128xf32>
    %319 = tpu.matmul %317, %318, %cst_128 {dimension_numbers = #tpu.dot_dimension_numbers<[1], [0], [0], [1], [0, 0, 1, 1], [], []>} : vector<16x8xf32>, vector<8x128xf32>, vector<16x128xf32> -> vector<16x128xf32>
    %320 = arith.addf %269, %319 : vector<16x128xf32>
    %321 = vector.extract_strided_slice %315 {offsets = [8, 0], sizes = [8, 128], strides = [1, 1]} : vector<128x128xf32> to vector<8x128xf32>
    %cst_129 = arith.constant dense<0.000000e+00> : vector<16x128xf32>
    %322 = tpu.matmul %317, %321, %cst_129 {dimension_numbers = #tpu.dot_dimension_numbers<[1], [0], [0], [1], [0, 0, 1, 1], [], []>} : vector<16x8xf32>, vector<8x128xf32>, vector<16x128xf32> -> vector<16x128xf32>
    %323 = arith.addf %272, %322 : vector<16x128xf32>
    %324 = vector.extract_strided_slice %315 {offsets = [16, 0], sizes = [8, 128], strides = [1, 1]} : vector<128x128xf32> to vector<8x128xf32>
    %cst_130 = arith.constant dense<0.000000e+00> : vector<16x128xf32>
    %325 = tpu.matmul %317, %324, %cst_130 {dimension_numbers = #tpu.dot_dimension_numbers<[1], [0], [0], [1], [0, 0, 1, 1], [], []>} : vector<16x8xf32>, vector<8x128xf32>, vector<16x128xf32> -> vector<16x128xf32>
    %326 = arith.addf %275, %325 : vector<16x128xf32>
    %327 = vector.extract_strided_slice %315 {offsets = [24, 0], sizes = [8, 128], strides = [1, 1]} : vector<128x128xf32> to vector<8x128xf32>
    %cst_131 = arith.constant dense<0.000000e+00> : vector<16x128xf32>
    %328 = tpu.matmul %317, %327, %cst_131 {dimension_numbers = #tpu.dot_dimension_numbers<[1], [0], [0], [1], [0, 0, 1, 1], [], []>} : vector<16x8xf32>, vector<8x128xf32>, vector<16x128xf32> -> vector<16x128xf32>
    %329 = arith.addf %278, %328 : vector<16x128xf32>
    %330 = vector.extract_strided_slice %315 {offsets = [32, 0], sizes = [8, 128], strides = [1, 1]} : vector<128x128xf32> to vector<8x128xf32>
    %cst_132 = arith.constant dense<0.000000e+00> : vector<16x128xf32>
    %331 = tpu.matmul %317, %330, %cst_132 {dimension_numbers = #tpu.dot_dimension_numbers<[1], [0], [0], [1], [0, 0, 1, 1], [], []>} : vector<16x8xf32>, vector<8x128xf32>, vector<16x128xf32> -> vector<16x128xf32>
    %332 = arith.addf %281, %331 : vector<16x128xf32>
    %333 = vector.extract_strided_slice %315 {offsets = [40, 0], sizes = [8, 128], strides = [1, 1]} : vector<128x128xf32> to vector<8x128xf32>
    %cst_133 = arith.constant dense<0.000000e+00> : vector<16x128xf32>
    %334 = tpu.matmul %317, %333, %cst_133 {dimension_numbers = #tpu.dot_dimension_numbers<[1], [0], [0], [1], [0, 0, 1, 1], [], []>} : vector<16x8xf32>, vector<8x128xf32>, vector<16x128xf32> -> vector<16x128xf32>
    %335 = arith.addf %284, %334 : vector<16x128xf32>
    %336 = vector.extract_strided_slice %315 {offsets = [48, 0], sizes = [8, 128], strides = [1, 1]} : vector<128x128xf32> to vector<8x128xf32>
    %cst_134 = arith.constant dense<0.000000e+00> : vector<16x128xf32>
    %337 = tpu.matmul %317, %336, %cst_134 {dimension_numbers = #tpu.dot_dimension_numbers<[1], [0], [0], [1], [0, 0, 1, 1], [], []>} : vector<16x8xf32>, vector<8x128xf32>, vector<16x128xf32> -> vector<16x128xf32>
    %338 = arith.addf %287, %337 : vector<16x128xf32>
    %339 = vector.extract_strided_slice %315 {offsets = [56, 0], sizes = [8, 128], strides = [1, 1]} : vector<128x128xf32> to vector<8x128xf32>
    %cst_135 = arith.constant dense<0.000000e+00> : vector<16x128xf32>
    %340 = tpu.matmul %317, %339, %cst_135 {dimension_numbers = #tpu.dot_dimension_numbers<[1], [0], [0], [1], [0, 0, 1, 1], [], []>} : vector<16x8xf32>, vector<8x128xf32>, vector<16x128xf32> -> vector<16x128xf32>
    %341 = arith.addf %290, %340 : vector<16x128xf32>
    %342 = vector.extract_strided_slice %315 {offsets = [64, 0], sizes = [8, 128], strides = [1, 1]} : vector<128x128xf32> to vector<8x128xf32>
    %cst_136 = arith.constant dense<0.000000e+00> : vector<16x128xf32>
    %343 = tpu.matmul %317, %342, %cst_136 {dimension_numbers = #tpu.dot_dimension_numbers<[1], [0], [0], [1], [0, 0, 1, 1], [], []>} : vector<16x8xf32>, vector<8x128xf32>, vector<16x128xf32> -> vector<16x128xf32>
    %344 = arith.addf %293, %343 : vector<16x128xf32>
    %345 = vector.extract_strided_slice %315 {offsets = [72, 0], sizes = [8, 128], strides = [1, 1]} : vector<128x128xf32> to vector<8x128xf32>
    %cst_137 = arith.constant dense<0.000000e+00> : vector<16x128xf32>
    %346 = tpu.matmul %317, %345, %cst_137 {dimension_numbers = #tpu.dot_dimension_numbers<[1], [0], [0], [1], [0, 0, 1, 1], [], []>} : vector<16x8xf32>, vector<8x128xf32>, vector<16x128xf32> -> vector<16x128xf32>
    %347 = arith.addf %296, %346 : vector<16x128xf32>
    %348 = vector.extract_strided_slice %315 {offsets = [80, 0], sizes = [8, 128], strides = [1, 1]} : vector<128x128xf32> to vector<8x128xf32>
    %cst_138 = arith.constant dense<0.000000e+00> : vector<16x128xf32>
    %349 = tpu.matmul %317, %348, %cst_138 {dimension_numbers = #tpu.dot_dimension_numbers<[1], [0], [0], [1], [0, 0, 1, 1], [], []>} : vector<16x8xf32>, vector<8x128xf32>, vector<16x128xf32> -> vector<16x128xf32>
    %350 = arith.addf %299, %349 : vector<16x128xf32>
    %351 = vector.extract_strided_slice %315 {offsets = [88, 0], sizes = [8, 128], strides = [1, 1]} : vector<128x128xf32> to vector<8x128xf32>
    %cst_139 = arith.constant dense<0.000000e+00> : vector<16x128xf32>
    %352 = tpu.matmul %317, %351, %cst_139 {dimension_numbers = #tpu.dot_dimension_numbers<[1], [0], [0], [1], [0, 0, 1, 1], [], []>} : vector<16x8xf32>, vector<8x128xf32>, vector<16x128xf32> -> vector<16x128xf32>
    %353 = arith.addf %302, %352 : vector<16x128xf32>
    %354 = vector.extract_strided_slice %315 {offsets = [96, 0], sizes = [8, 128], strides = [1, 1]} : vector<128x128xf32> to vector<8x128xf32>
    %cst_140 = arith.constant dense<0.000000e+00> : vector<16x128xf32>
    %355 = tpu.matmul %317, %354, %cst_140 {dimension_numbers = #tpu.dot_dimension_numbers<[1], [0], [0], [1], [0, 0, 1, 1], [], []>} : vector<16x8xf32>, vector<8x128xf32>, vector<16x128xf32> -> vector<16x128xf32>
    %356 = arith.addf %305, %355 : vector<16x128xf32>
    %357 = vector.extract_strided_slice %315 {offsets = [104, 0], sizes = [8, 128], strides = [1, 1]} : vector<128x128xf32> to vector<8x128xf32>
    %cst_141 = arith.constant dense<0.000000e+00> : vector<16x128xf32>
    %358 = tpu.matmul %317, %357, %cst_141 {dimension_numbers = #tpu.dot_dimension_numbers<[1], [0], [0], [1], [0, 0, 1, 1], [], []>} : vector<16x8xf32>, vector<8x128xf32>, vector<16x128xf32> -> vector<16x128xf32>
    %359 = arith.addf %308, %358 : vector<16x128xf32>
    %360 = vector.extract_strided_slice %315 {offsets = [112, 0], sizes = [8, 128], strides = [1, 1]} : vector<128x128xf32> to vector<8x128xf32>
    %cst_142 = arith.constant dense<0.000000e+00> : vector<16x128xf32>
    %361 = tpu.matmul %317, %360, %cst_142 {dimension_numbers = #tpu.dot_dimension_numbers<[1], [0], [0], [1], [0, 0, 1, 1], [], []>} : vector<16x8xf32>, vector<8x128xf32>, vector<16x128xf32> -> vector<16x128xf32>
    %362 = arith.addf %311, %361 : vector<16x128xf32>
    %363 = vector.extract_strided_slice %315 {offsets = [120, 0], sizes = [8, 128], strides = [1, 1]} : vector<128x128xf32> to vector<8x128xf32>
    %cst_143 = arith.constant dense<0.000000e+00> : vector<16x128xf32>
    %364 = tpu.matmul %317, %363, %cst_143 {dimension_numbers = #tpu.dot_dimension_numbers<[1], [0], [0], [1], [0, 0, 1, 1], [], []>} : vector<16x8xf32>, vector<8x128xf32>, vector<16x128xf32> -> vector<16x128xf32>
    %365 = arith.addf %314, %364 : vector<16x128xf32>
    %366 = tpu.concatenate %320, %323, %326, %329, %332, %335, %338, %341, %344, %347, %350, %353, %356, %359, %362, %365 in 0 : vector<16x128xf32>, vector<16x128xf32>, vector<16x128xf32>, vector<16x128xf32>, vector<16x128xf32>, vector<16x128xf32>, vector<16x128xf32>, vector<16x128xf32>, vector<16x128xf32>, vector<16x128xf32>, vector<16x128xf32>, vector<16x128xf32>, vector<16x128xf32>, vector<16x128xf32>, vector<16x128xf32>, vector<16x128xf32> -> vector<256x128xf32>
    %c0_144 = arith.constant 0 : index
    %c0_145 = arith.constant 0 : index
    %367 = vector.load %arg6[%c0_144, %c0_145] : memref<256x128xf32, #tpu.memory_space<vmem>>, vector<256x128xf32>
    tpu.vector_store %arg6[%c0_144, %c0_145], %366 {strides = array<i32>} : memref<256x128xf32, #tpu.memory_space<vmem>>, vector<256x128xf32>,
    return
  }
  func.func @transform_0(%arg0: i32) -> i32 {
    %c0_i32 = arith.constant 0 : i32
    %c0_i32_0 = arith.constant 0 : i32
    return %c0_i32 : i32
  }
  func.func @transform_1(%arg0: i32) -> (i32, i32) {
    %c0_i32 = arith.constant 0 : i32
    %c0_i32_0 = arith.constant 0 : i32
    return %arg0, %c0_i32 : i32, i32
  }
  func.func @transform_2(%arg0: i32) -> (i32, i32, i32) {
    %c0_i32 = arith.constant 0 : i32
    %c0_i32_0 = arith.constant 0 : i32
    %c0_i32_1 = arith.constant 0 : i32
    %c0_i32_2 = arith.constant 0 : i32
    return %c0_i32, %c0_i32_0, %c0_i32_1 : i32, i32, i32
  }
  func.func @transform_3(%arg0: i32) -> (i32, i32, i32) {
    %c0_i32 = arith.constant 0 : i32
    %c0_i32_0 = arith.constant 0 : i32
    %c0_i32_1 = arith.constant 0 : i32
    %c0_i32_2 = arith.constant 0 : i32
    return %c0_i32, %c0_i32_0, %c0_i32_1 : i32, i32, i32
  }
  func.func @transform_4(%arg0: i32) -> (i32, i32) {
    %c0_i32 = arith.constant 0 : i32
    %c0_i32_0 = arith.constant 0 : i32
    %c0_i32_1 = arith.constant 0 : i32
    return %c0_i32, %c0_i32_0 : i32, i32
  }
  func.func @transform_5(%arg0: i32) -> (i32, i32) {
    %c0_i32 = arith.constant 0 : i32
    %c0_i32_0 = arith.constant 0 : i32
    return %arg0, %c0_i32 : i32, i32
  }
}

</mosaic_0001>

<bundles_post_ra>
// kernel: tpu_custom_call.1
= control target key start
LH: loop header
LB: loop body
LE: loop exit
PB: predicated region body
PF: predicated region fallthrough
CT: control target
= control target key end

     0   :  { %11 = vsyncpa [#allocation4], 0  ;;  %s12962_s0 = inlined_call_operand.<no memory space> [shape: s32[1], index: 0, kind: input, shape index: {}]   ;;  %s12963_s1 = inlined_call_operand.vmem [shape: f32[128,128], index: 1, kind: input, shape index: {}]   ;;  %s12964_s2 = inlined_call_operand.hbm [shape: f32[3,128,128], index: 2, kind: input, shape index: {}]   ;;  %s12965_s3 = inlined_call_operand.vmem [shape: f32[7,16,8], index: 3, kind: input, shape index: {}]   ;;  %s12966_s4 = inlined_call_operand.vmem [shape: f32[16,1], index: 4, kind: input, shape index: {}]   ;;  %s12967_s5 = inlined_call_operand.hbm [shape: f32[256,128], index: 5, kind: output, shape index: {}]  }
   0x1   :  { %12 = vsyncpa [#allocation5], 0  ;;  %s11866_s18 = smov [#allocation3]   ;;  %s11818_s21 = scalar_lea.hbm %s12964_s2, 6144 }
   0x2   :  { %s22_s19 = sshll.u32 %s11866_s18, 4  ;;  %p11819_p0 = scmp.ne.s32.totalorder %s12964_s2, %s11818_s21  ;;  %s23_s19 = int_to_ptr.vmem [resolvable:$true] %s22_s19 }
   0x3   :  { %p11822_p1 = scmp.lt.u32.totalorder %s11818_s21, %s12964_s2 }
   0x5   :  { %p11824_p2 = pnand %p11822_p1, %p11819_p0 }
   0x7   :  { %11827 = shalt.err (!%p11824_p2)
}
   0x8   :  { %s11828_s26 = scalar_lea.vmem %s23_s19, 6144  ;;  %p11833_p4 = scmp.lt.s32.totalorder %s23_s19, %s23_s19 }
   0x9   :  { %p11829_p3 = scmp.ne.s32.totalorder %s23_s19, %s11828_s26  ;;  %p11834_p5 = scmp.lt.s32.totalorder %s11828_s26, %s11828_s26 }
   0xb   :  { %p11835_p6 = por %p11834_p5, %p11833_p4 }
   0xd   :  { %p11836_p7 = pnand %p11835_p6, %p11829_p3 }
   0xf   :  { %11839 = shalt.err (!%p11836_p7)
}
  0x10   :  { %s11867_s27 = smov 128   ;;  %s11868_s28 = smov 8  }
  0x11   :  { %28 = dma.hbm_to_vmem [thread:$0]  %s12964_s2, 6144, %s23_s19, [#allocation4], %s11867_s27, %s11867_s27, %s11868_s28  }
  0x12   :  { %11862 = dma.done.wait [#allocation4], 6144  }
  0x13   :  { %11863 = vsyncadd [#allocation4], 4294961152  ;;  %vm66_vm0 = vcmask 64512   ;;  %v11919_v0 = vld [vmem:[%s12963_s1] sm:$0xff]  ;;  %v11929_v2 = vld [vmem:[%s12965_s3 + $0x8] sm:$0xff] }
  0x14   :  { %v11924_v1 = vld [vmem:[%s12965_s3] sm:$0xff]  ;;  %10484 = vmatprep.subr.mxu0 %v11919_v0  ;;  %v11937_v3 = vld [vmem:[%s12963_s1 + $0x10] sm:$0xff]  ;;  %v11967_v6 = vld [vmem:[%s12963_s1 + $0x8] sm:$0xff] }
  0x15   :  { %10486 = vmatprep.mubr.msk.f32.mxu0 %vm66_vm0, %v11924_v1  ;;  %10485 = vmatpush3.msra.mxu0 %v11919_v0  ;;  %v11943_v4 = vld [vmem:[%s12963_s1 + $0x20] sm:$0xff]  ;;  %v11957_v5 = vld [vmem:[%s12963_s1 + $0x30] sm:$0xff]  ;;  %v11987_v8 = vld [vmem:[%s12963_s1 + $0x18] sm:$0xff] }
  0x16   :  { %10491 = vmatprep.mubr.msk.f32.mxu1 %vm66_vm0, %v11924_v1  ;;  %10487 = vmatmul.mubr.msk.f32.vlgmr.msra.gmra.mrb[0].mxu0 %vm66_vm0, %v11929_v2  ;;  %v11974_v7 = vld [vmem:[%s12963_s1 + $0x40] sm:$0xff]  ;;  %v11994_v9 = vld [vmem:[%s12963_s1 + $0x50] sm:$0xff]  ;;  %v12009_v10 = vld [vmem:[%s12963_s1 + $0x28] sm:$0xff] }
  0x17   :  { %10494 = vmatprep.subr.mxu0 %v11937_v3  ;;  %10496 = vmatprep.mubr.msk.f32.mxu0 %vm66_vm0, %v11924_v1  ;;  %v12016_v11 = vld [vmem:[%s12963_s1 + $0x60] sm:$0xff]  ;;  %v12031_v12 = vld [vmem:[%s12963_s1 + $0x38] sm:$0xff]  ;;  %v12038_v13 = vld [vmem:[%s12963_s1 + $0x70] sm:$0xff] }
  0x18   :  { %10495 = vmatpush3.msra.mxu0 %v11937_v3  ;;  %10489 = vmatprep.subr.mxu1 %v11967_v6  ;;  %v1305_v14 = vld [vmem:[#allocation3] sm:$0xff]  ;;  %v1306_v15 = vld [vmem:[#allocation3 + $0x8] sm:$0xff]  ;;  %v1307_v18 = vld [vmem:[#allocation3 + $0x10] sm:$0xff] }
  0x19   :  { %10504 = vmatprep.subr.mxu0 %v11943_v4  ;;  %10490 = vmatpush3.msra.mxu1 %v11967_v6  ;;  %v12053_v16 = vld [vmem:[%s12963_s1 + $0x48] sm:$0xff]  ;;  %v12056_v17 = vpack.c.bf16 %v1306_v15, %v1305_v14  ;;  %v1308_v19 = vld [vmem:[#allocation3 + $0x18] sm:$0xff]  ;;  %v1309_v22 = vld [vmem:[#allocation3 + $0x20] sm:$0xff] }
  0x1a   :  { %10497 = vmatmul.mubr.msk.f32.vlgmr.msra.gmra.mrb[2].mxu0 %vm66_vm0, %v11929_v2  ;;  %10492 = vmatmul.mubr.msk.f32.vlgmr.msra.gmra.mrb[0].mxu1 %vm66_vm0, %v11929_v2  ;;  %v12072_v20 = vld [vmem:[%s12963_s1 + $0x58] sm:$0xff]  ;;  %v12075_v21 = vpack.c.bf16 %v1308_v19, %v1307_v18  ;;  %v1310_v23 = vld [vmem:[#allocation3 + $0x28] sm:$0xff]  ;;  %v1311_v26 = vld [vmem:[#allocation3 + $0x30] sm:$0xff] }
  0x1b   :  { %10505 = vmatpush3.msra.mxu0 %v11943_v4  ;;  %10506 = vmatprep.mubr.msk.f32.mxu0 %vm66_vm0, %v11924_v1  ;;  %v12090_v24 = vld [vmem:[%s12963_s1 + $0x68] sm:$0xff]  ;;  %v12093_v25 = vpack.c.bf16 %v1310_v23, %v1309_v22  ;;  %v1312_v27 = vld [vmem:[#allocation3 + $0x38] sm:$0xff]  ;;  %v1313_v30 = vld [vmem:[#allocation3 + $0x40] sm:$0xff] }
  0x1c   :  { %10514 = vmatprep.subr.mxu0 %v11957_v5  ;;  %10499 = vmatprep.subr.mxu1 %v11987_v8  ;;  %v12099_v28 = vld [vmem:[%s12963_s1 + $0x78] sm:$0xff]  ;;  %v12110_v29 = vpack.c.bf16 %v1312_v27, %v1311_v26  ;;  %v1314_v31 = vld [vmem:[#allocation3 + $0x48] sm:$0xff]  ;;  %v1315_v33 = vld [vmem:[#allocation3 + $0x50] sm:$0xff] }
  0x1d   :  { %10500 = vmatpush3.msra.mxu1 %v11987_v8  ;;  %10501 = vmatprep.mubr.msk.f32.mxu1 %vm66_vm0, %v11924_v1  ;;  %v12118_v32 = vpack.c.bf16 %v1314_v31, %v1313_v30  ;;  %v1316_v34 = vld [vmem:[#allocation3 + $0x58] sm:$0xff]  ;;  %v1317_v36 = vld [vmem:[#allocation3 + $0x60] sm:$0xff]  ;;  %v1318_v37 = vld [vmem:[#allocation3 + $0x68] sm:$0xff] }
  0x1e   :  { %10507 = vmatmul.mubr.msk.f32.vlgmr.msra.gmra.mrb[4].mxu0 %vm66_vm0, %v11929_v2  ;;  %10502 = vmatmul.mubr.msk.f32.vlgmr.msra.gmra.mrb[2].mxu1 %vm66_vm0, %v11929_v2  ;;  %v12122_v35 = vpack.c.bf16 %v1316_v34, %v1315_v33  ;;  %v12126_v38 = vpack.c.bf16 %v1318_v37, %v1317_v36  ;;  %v1319_v39 = vld [vmem:[#allocation3 + $0x70] sm:$0xff]  ;;  %v1320_v40 = vld [vmem:[#allocation3 + $0x78] sm:$0xff]  ;;  %v12288_v60 = vld [vmem:[%s12965_s3 + $0x20] sm:$0xff] }
  0x1f   :  { %10515 = vmatpush3.msra.mxu0 %v11957_v5  ;;  %10516 = vmatprep.mubr.msk.f32.mxu0 %vm66_vm0, %v11924_v1  ;;  %v12130_v41 = vpack.c.bf16 %v1320_v40, %v1319_v39  ;;  %v12153_v42 = vld [vmem:[%s12965_s3 + $0x10] sm:$0xff]  ;;  %v12164_v44 = vld [vmem:[%s12965_s3 + $0x18] sm:$0xff]  ;;  %v12297_v62 = vld [vmem:[%s12965_s3 + $0x28] sm:$0xff] }
  0x20   :  { %10524 = vmatprep.subr.mxu0 %v11974_v7  ;;  %10509 = vmatprep.subr.mxu1 %v12009_v10  ;;  %v4094_v27 = vld [vmem:[#allocation3 + $0x80] sm:$0xff]  ;;  %v4096_v30 = vld [vmem:[#allocation3 + $0x90] sm:$0xff]  ;;  %v4097_v31 = vld [vmem:[#allocation3 + $0x98] sm:$0xff] }
  0x21   :  { %10510 = vmatpush3.msra.mxu1 %v12009_v10  ;;  %10511 = vmatprep.mubr.msk.f32.mxu1 %vm66_vm0, %v11924_v1  ;;  %v4098_v36 = vld [vmem:[#allocation3 + $0xa0] sm:$0xff]  ;;  %v4099_v37 = vld [vmem:[#allocation3 + $0xa8] sm:$0xff]  ;;  %v4100_v39 = vld [vmem:[#allocation3 + $0xb0] sm:$0xff] }
  0x22   :  { %10517 = vmatmul.mubr.msk.f32.vlgmr.msra.gmra.mrb[6].mxu0 %vm66_vm0, %v11929_v2  ;;  %10512 = vmatmul.mubr.msk.f32.vlgmr.msra.gmra.mrb[4].mxu1 %vm66_vm0, %v11929_v2  ;;  %v4101_v40 = vld [vmem:[#allocation3 + $0xb8] sm:$0xff] }
  0x23   :  { %10525 = vmatpush3.msra.mxu0 %v11974_v7  ;;  %10526 = vmatprep.mubr.msk.f32.mxu0 %vm66_vm0, %v11924_v1 }
  0x24   :  { %10534 = vmatprep.subr.mxu0 %v11994_v9  ;;  %10519 = vmatprep.subr.mxu1 %v12031_v12 }
  0x25   :  { %10520 = vmatpush3.msra.mxu1 %v12031_v12  ;;  %10521 = vmatprep.mubr.msk.f32.mxu1 %vm66_vm0, %v11924_v1 }
  0x26   :  { %10527 = vmatmul.mubr.msk.f32.vlgmr.msra.gmra.mrb[8].mxu0 %vm66_vm0, %v11929_v2  ;;  %10522 = vmatmul.mubr.msk.f32.vlgmr.msra.gmra.mrb[6].mxu1 %vm66_vm0, %v11929_v2 }
  0x27   :  { %10535 = vmatpush3.msra.mxu0 %v11994_v9  ;;  %10536 = vmatprep.mubr.msk.f32.mxu0 %vm66_vm0, %v11924_v1 }
  0x28   :  { %10544 = vmatprep.subr.mxu0 %v12016_v11  ;;  %10529 = vmatprep.subr.mxu1 %v12053_v16 }
  0x29   :  { %10530 = vmatpush3.msra.mxu1 %v12053_v16  ;;  %10531 = vmatprep.mubr.msk.f32.mxu1 %vm66_vm0, %v11924_v1 }
  0x2a   :  { %10537 = vmatmul.mubr.msk.f32.vlgmr.msra.gmra.mrb[10].mxu0 %vm66_vm0, %v11929_v2  ;;  %10532 = vmatmul.mubr.msk.f32.vlgmr.msra.gmra.mrb[8].mxu1 %vm66_vm0, %v11929_v2 }
  0x2b   :  { %10545 = vmatpush3.msra.mxu0 %v12016_v11  ;;  %10546 = vmatprep.mubr.msk.f32.mxu0 %vm66_vm0, %v11924_v1 }
  0x2c   :  { %10554 = vmatprep.subr.mxu0 %v12038_v13  ;;  %10539 = vmatprep.subr.mxu1 %v12072_v20 }
  0x2d   :  { %10540 = vmatpush3.msra.mxu1 %v12072_v20  ;;  %10541 = vmatprep.mubr.msk.f32.mxu1 %vm66_vm0, %v11924_v1 }
  0x2e   :  { %10547 = vmatmul.mubr.msk.f32.vlgmr.msra.gmra.mrb[12].mxu0 %vm66_vm0, %v11929_v2  ;;  %10542 = vmatmul.mubr.msk.f32.vlgmr.msra.gmra.mrb[10].mxu1 %vm66_vm0, %v11929_v2 }
  0x2f   :  { %10555 = vmatpush3.msra.mxu0 %v12038_v13  ;;  %10556 = vmatprep.mubr.msk.f32.mxu0 %vm66_vm0, %v11924_v1 }
  0x30   :  { %11381 = vmatprep.subr.bf16.mxu0 %v12056_v17  ;;  %10549 = vmatprep.subr.mxu1 %v12090_v24 }
  0x31   :  { %10550 = vmatpush3.msra.mxu1 %v12090_v24  ;;  %10551 = vmatprep.mubr.msk.f32.mxu1 %vm66_vm0, %v11924_v1 }
  0x32   :  { %10557 = vmatmul.mubr.msk.f32.vlgmr.msra.gmra.mrb[14].mxu0 %vm66_vm0, %v11929_v2  ;;  %10552 = vmatmul.mubr.msk.f32.vlgmr.msra.gmra.mrb[12].mxu1 %vm66_vm0, %v11929_v2 }
  0x33   :  { %11383 = vmatpush3.bf16.msra.mxu0 %v12056_v17  ;;  %10596 = vmatprep.mubr.f32.mxu0 %v11919_v0 }
  0x34   :  { %11385 = vmatprep.subr.bf16.mxu0 %v12075_v21  ;;  %10559 = vmatprep.subr.mxu1 %v12099_v28 }
  0x35   :  { %10560 = vmatpush3.msra.mxu1 %v12099_v28  ;;  %10561 = vmatprep.mubr.msk.f32.mxu1 %vm66_vm0, %v11924_v1 }
  0x36   :  { %10562 = vmatmul.mubr.msk.f32.vlgmr.msra.gmra.mrb[14].mxu1 %vm66_vm0, %v11929_v2 }
  0x37   :  { %11387 = vmatpush3.bf16.msra.mxu0 %v12075_v21  ;;  %10627 = vmatprep.mubr.msk.f32.mxu1 %vm66_vm0, %v12153_v42 }
  0x38   :  { %11389 = vmatprep.subr.bf16.mxu0 %v12093_v25 }
  0x3b   :  { %11391 = vmatpush3.bf16.msra.mxu0 %v12093_v25 }
  0x3c   :  { %11393 = vmatprep.subr.bf16.mxu0 %v12110_v29 }
  0x3f   :  { %11395 = vmatpush3.bf16.msra.mxu0 %v12110_v29 }
  0x40   :  { %11397 = vmatprep.subr.bf16.mxu0 %v12118_v32 }
  0x43   :  { %11399 = vmatpush3.bf16.msra.mxu0 %v12118_v32 }
  0x44   :  { %11401 = vmatprep.subr.bf16.mxu0 %v12122_v35 }
  0x47   :  { %11403 = vmatpush3.bf16.msra.mxu0 %v12122_v35 }
  0x48   :  { %11405 = vmatprep.subr.bf16.mxu0 %v12126_v38 }
  0x4b   :  { %11407 = vmatpush3.bf16.msra.mxu0 %v12126_v38 }
  0x4c   :  { %11409 = vmatprep.subr.bf16.mxu0 %v12130_v41 }
  0x4f   :  { %11411 = vmatpush3.bf16.msra.mxu0 %v12130_v41 }
  0x52   :  { %10597 = vmatmul.mubr.f32.vlgmr.msra.gmra.mrb[16].mxu0 %v11967_v6 }
  0x53   :  { %10599 = vmatprep.mubr.f32.mxu0 %v11937_v3 }
  0x56   :  { %10600 = vmatmul.mubr.f32.gmra.mrb[18].mxu0 %v11987_v8 }
  0x57   :  { %10602 = vmatprep.mubr.f32.mxu0 %v11943_v4 }
  0x5a   :  { %10603 = vmatmul.mubr.f32.gmra.mrb[20].mxu0 %v12009_v10 }
  0x5b   :  { %10605 = vmatprep.mubr.f32.mxu0 %v11957_v5 }
  0x5e   :  { %10606 = vmatmul.mubr.f32.gmra.mrb[22].mxu0 %v12031_v12 }
  0x5f   :  { %10608 = vmatprep.mubr.f32.mxu0 %v11974_v7 }
  0x62   :  { %10609 = vmatmul.mubr.f32.gmra.mrb[24].mxu0 %v12053_v16 }
  0x63   :  { %10611 = vmatprep.mubr.f32.mxu0 %v11994_v9 }
  0x66   :  { %10612 = vmatmul.mubr.f32.gmra.mrb[26].mxu0 %v12072_v20 }
  0x67   :  { %10614 = vmatprep.mubr.f32.mxu0 %v12016_v11 }
  0x6a   :  { %10615 = vmatmul.mubr.f32.gmra.mrb[28].mxu0 %v12090_v24 }
  0x6b   :  { %10617 = vmatprep.mubr.f32.mxu0 %v12038_v13 }
  0x6e   :  { %10618 = vmatmul.mubr.f32.gmra.mrb[30].mxu0 %v12099_v28 }
  0x6f   :  { %10622 = vmatprep.mubr.msk.f32.mxu0 %vm66_vm0, %v12153_v42 }
 0x125   :  { %v12159_v43 = vpop.f32.mrb[16].mxu0 }
 0x126   :  { %v12166_v45 = vpop.f32.mrb[17].mxu0  ;;  %10625 = vmatprep.subr.mxu1 %v12159_v43 }
 0x127   :  { %10620 = vmatprep.subr.mxu0 %v12166_v45  ;;  %10626 = vmatpush3.msra.mxu1 %v12159_v43 }
 0x128   :  { %10621 = vmatpush3.msra.mxu0 %v12166_v45  ;;  %10628 = vmatmul.mubr.msk.f32.vlgmr.msra.gmra.mrb[0].mxu1 %vm66_vm0, %v12164_v44 }
 0x129   :  { %v12174_v46 = vpop.f32.mrb[18].mxu0  ;;  %10637 = vmatprep.mubr.msk.f32.mxu1 %vm66_vm0, %v12153_v42  ;;  %10623 = vmatmul.mubr.msk.f32.vlgmr.msra.gmra.mrb[0].mxu0 %vm66_vm0, %v12164_v44 }
 0x12a   :  { %v12180_v47 = vpop.f32.mrb[19].mxu0  ;;  %10635 = vmatprep.subr.mxu1 %v12174_v46  ;;  %10632 = vmatprep.mubr.msk.f32.mxu0 %vm66_vm0, %v12153_v42 }
 0x12b   :  { %10630 = vmatprep.subr.mxu0 %v12180_v47  ;;  %10636 = vmatpush3.msra.mxu1 %v12174_v46 }
 0x12c   :  { %10631 = vmatpush3.msra.mxu0 %v12180_v47  ;;  %10638 = vmatmul.mubr.msk.f32.vlgmr.msra.gmra.mrb[2].mxu1 %vm66_vm0, %v12164_v44 }
 0x12d   :  { %v12190_v48 = vpop.f32.mrb[20].mxu0  ;;  %10647 = vmatprep.mubr.msk.f32.mxu1 %vm66_vm0, %v12153_v42  ;;  %10633 = vmatmul.mubr.msk.f32.vlgmr.msra.gmra.mrb[2].mxu0 %vm66_vm0, %v12164_v44 }
 0x12e   :  { %v12196_v49 = vpop.f32.mrb[21].mxu0  ;;  %10645 = vmatprep.subr.mxu1 %v12190_v48  ;;  %10642 = vmatprep.mubr.msk.f32.mxu0 %vm66_vm0, %v12153_v42 }
 0x12f   :  { %10640 = vmatprep.subr.mxu0 %v12196_v49  ;;  %10646 = vmatpush3.msra.mxu1 %v12190_v48 }
 0x130   :  { %10641 = vmatpush3.msra.mxu0 %v12196_v49  ;;  %10648 = vmatmul.mubr.msk.f32.vlgmr.msra.gmra.mrb[4].mxu1 %vm66_vm0, %v12164_v44 }
 0x131   :  { %v12206_v50 = vpop.f32.mrb[22].mxu0  ;;  %10657 = vmatprep.mubr.msk.f32.mxu1 %vm66_vm0, %v12153_v42  ;;  %10643 = vmatmul.mubr.msk.f32.vlgmr.msra.gmra.mrb[4].mxu0 %vm66_vm0, %v12164_v44 }
 0x132   :  { %v12212_v51 = vpop.f32.mrb[23].mxu0  ;;  %10655 = vmatprep.subr.mxu1 %v12206_v50  ;;  %10652 = vmatprep.mubr.msk.f32.mxu0 %vm66_vm0, %v12153_v42 }
 0x133   :  { %10650 = vmatprep.subr.mxu0 %v12212_v51  ;;  %10656 = vmatpush3.msra.mxu1 %v12206_v50 }
 0x134   :  { %10651 = vmatpush3.msra.mxu0 %v12212_v51  ;;  %10658 = vmatmul.mubr.msk.f32.vlgmr.msra.gmra.mrb[6].mxu1 %vm66_vm0, %v12164_v44 }
 0x135   :  { %v12222_v52 = vpop.f32.mrb[24].mxu0  ;;  %10667 = vmatprep.mubr.msk.f32.mxu1 %vm66_vm0, %v12153_v42  ;;  %10653 = vmatmul.mubr.msk.f32.vlgmr.msra.gmra.mrb[6].mxu0 %vm66_vm0, %v12164_v44 }
 0x136   :  { %v1427_v53 = vpop.f32.mrb[25].mxu0  ;;  %10665 = vmatprep.subr.mxu1 %v12222_v52  ;;  %10662 = vmatprep.mubr.msk.f32.mxu0 %vm66_vm0, %v12153_v42 }
 0x137   :  { %10660 = vmatprep.subr.mxu0 %v1427_v53  ;;  %10666 = vmatpush3.msra.mxu1 %v12222_v52 }
 0x138   :  { %10661 = vmatpush3.msra.mxu0 %v1427_v53  ;;  %10668 = vmatmul.mubr.msk.f32.vlgmr.msra.gmra.mrb[8].mxu1 %vm66_vm0, %v12164_v44 }
 0x139   :  { %v10613_v54 = vpop.f32.mrb[26].mxu0  ;;  %10677 = vmatprep.mubr.msk.f32.mxu1 %vm66_vm0, %v12153_v42  ;;  %10663 = vmatmul.mubr.msk.f32.vlgmr.msra.gmra.mrb[8].mxu0 %vm66_vm0, %v12164_v44 }
 0x13a   :  { %v1437_v55 = vpop.f32.mrb[27].mxu0  ;;  %10675 = vmatprep.subr.mxu1 %v10613_v54  ;;  %10672 = vmatprep.mubr.msk.f32.mxu0 %vm66_vm0, %v12153_v42 }
 0x13b   :  { %10670 = vmatprep.subr.mxu0 %v1437_v55  ;;  %10676 = vmatpush3.msra.mxu1 %v10613_v54 }
 0x13c   :  { %10671 = vmatpush3.msra.mxu0 %v1437_v55  ;;  %10678 = vmatmul.mubr.msk.f32.vlgmr.msra.gmra.mrb[10].mxu1 %vm66_vm0, %v12164_v44 }
 0x13d   :  { %v10616_v56 = vpop.f32.mrb[28].mxu0  ;;  %10687 = vmatprep.mubr.msk.f32.mxu1 %vm66_vm0, %v12153_v42  ;;  %10673 = vmatmul.mubr.msk.f32.vlgmr.msra.gmra.mrb[10].mxu0 %vm66_vm0, %v12164_v44 }
 0x13e   :  { %v1447_v57 = vpop.f32.mrb[29].mxu0  ;;  %10685 = vmatprep.subr.mxu1 %v10616_v56  ;;  %10682 = vmatprep.mubr.msk.f32.mxu0 %vm66_vm0, %v12153_v42 }
 0x13f   :  { %10680 = vmatprep.subr.mxu0 %v1447_v57  ;;  %10686 = vmatpush3.msra.mxu1 %v10616_v56 }
 0x140   :  { %10681 = vmatpush3.msra.mxu0 %v1447_v57  ;;  %10688 = vmatmul.mubr.msk.f32.vlgmr.msra.gmra.mrb[12].mxu1 %vm66_vm0, %v12164_v44 }
 0x141   :  { %v10619_v58 = vpop.f32.mrb[30].mxu0  ;;  %10697 = vmatprep.mubr.msk.f32.mxu1 %vm66_vm0, %v12153_v42  ;;  %10683 = vmatmul.mubr.msk.f32.vlgmr.msra.gmra.mrb[12].mxu0 %vm66_vm0, %v12164_v44 }
 0x142   :  { %v1457_v59 = vpop.f32.mrb[31].mxu0  ;;  %10695 = vmatprep.subr.mxu1 %v10619_v58  ;;  %10692 = vmatprep.mubr.msk.f32.mxu0 %vm66_vm0, %v12153_v42  ;;  %v4102_v42 = vld [vmem:[#allocation3 + $0xc0] sm:$0xff] }
 0x143   :  { %10690 = vmatprep.subr.mxu0 %v1457_v59  ;;  %10696 = vmatpush3.msra.mxu1 %v10619_v58 }
 0x144   :  { %10691 = vmatpush3.msra.mxu0 %v1457_v59  ;;  %10698 = vmatmul.mubr.msk.f32.vlgmr.msra.gmra.mrb[14].mxu1 %vm66_vm0, %v12164_v44 }
 0x145   :  { %11413 = vmatprep.subr.bf16.mxu1 %v12056_v17  ;;  %10732 = vmatprep.mubr.f32.mxu1 %v12166_v45  ;;  %v4105_v45 = vld [vmem:[#allocation3 + $0xd8] sm:$0xff] }
 0x146   :  { %11415 = vmatpush3.bf16.msra.mxu1 %v12056_v17  ;;  %10693 = vmatmul.mubr.msk.f32.vlgmr.msra.gmra.mrb[14].mxu0 %vm66_vm0, %v12164_v44 }
 0x147   :  { %11417 = vmatprep.subr.bf16.mxu1 %v12075_v21  ;;  %10758 = vmatprep.mubr.msk.f32.mxu0 %vm66_vm0, %v12288_v60 }
 0x14a   :  { %11419 = vmatpush3.bf16.msra.mxu1 %v12075_v21 }
 0x14b   :  { %11421 = vmatprep.subr.bf16.mxu1 %v12093_v25 }
 0x14e   :  { %11423 = vmatpush3.bf16.msra.mxu1 %v12093_v25 }
 0x14f   :  { %11425 = vmatprep.subr.bf16.mxu1 %v12110_v29 }
 0x152   :  { %11427 = vmatpush3.bf16.msra.mxu1 %v12110_v29  ;;  %v4095_v29 = vld [vmem:[#allocation3 + $0x88] sm:$0xff] }
 0x153   :  { %11429 = vmatprep.subr.bf16.mxu1 %v12118_v32  ;;  %v12351_v33 = vpack.c.bf16 %v4095_v29, %v4094_v27 }
 0x156   :  { %11431 = vmatpush3.bf16.msra.mxu1 %v12118_v32 }
 0x157   :  { %11433 = vmatprep.subr.bf16.mxu1 %v12122_v35 }
 0x15a   :  { %11435 = vmatpush3.bf16.msra.mxu1 %v12122_v35  ;;  %v12357_v35 = vpack.c.bf16 %v4097_v31, %v4096_v30 }
 0x15b   :  { %11437 = vmatprep.subr.bf16.mxu1 %v12126_v38 }
 0x15e   :  { %11439 = vmatpush3.bf16.msra.mxu1 %v12126_v38  ;;  %v12367_v38 = vpack.c.bf16 %v4099_v37, %v4098_v36  ;;  %v6889_v36 = vld [vmem:[#allocation3 + $0x130] sm:$0xff]  ;;  %v6890_v37 = vld [vmem:[#allocation3 + $0x138] sm:$0xff] }
 0x15f   :  { %11441 = vmatprep.subr.bf16.mxu1 %v12130_v41 }
 0x162   :  { %11443 = vmatpush3.bf16.msra.mxu1 %v12130_v41  ;;  %v12371_v41 = vpack.c.bf16 %v4101_v40, %v4100_v39  ;;  %v6891_v39 = vld [vmem:[#allocation3 + $0x140] sm:$0xff]  ;;  %v6892_v40 = vld [vmem:[#allocation3 + $0x148] sm:$0xff] }
 0x165   :  { %10733 = vmatmul.mubr.f32.vlgmr.msra.gmra.mrb[16].mxu1 %v12159_v43  ;;  %v4103_v43 = vld [vmem:[#allocation3 + $0xc8] sm:$0xff] }
 0x166   :  { %10735 = vmatprep.mubr.f32.mxu1 %v12180_v47  ;;  %v12375_v44 = vpack.c.bf16 %v4103_v43, %v4102_v42  ;;  %v4106_v47 = vld [vmem:[#allocation3 + $0xe0] sm:$0xff]  ;;  %v6893_v42 = vld [vmem:[#allocation3 + $0x150] sm:$0xff]  ;;  %v6894_v43 = vld [vmem:[#allocation3 + $0x158] sm:$0xff] }
 0x169   :  { %10736 = vmatmul.mubr.f32.gmra.mrb[18].mxu1 %v12174_v46 }
 0x16a   :  { %10738 = vmatprep.mubr.f32.mxu1 %v12196_v49 }
 0x16d   :  { %10739 = vmatmul.mubr.f32.gmra.mrb[20].mxu1 %v12190_v48  ;;  %v4107_v48 = vld [vmem:[#allocation3 + $0xe8] sm:$0xff] }
 0x16e   :  { %10741 = vmatprep.mubr.f32.mxu1 %v12212_v51  ;;  %v12383_v49 = vpack.c.bf16 %v4107_v48, %v4106_v47  ;;  %v4109_v51 = vld [vmem:[#allocation3 + $0xf8] sm:$0xff]  ;;  %v6897_v47 = vld [vmem:[#allocation3 + $0x170] sm:$0xff] }
 0x16f   :  { %v6898_v48 = vld [vmem:[#allocation3 + $0x178] sm:$0xff] }
 0x171   :  { %10742 = vmatmul.mubr.f32.gmra.mrb[22].mxu1 %v12206_v50  ;;  %v4108_v50 = vld [vmem:[#allocation3 + $0xf0] sm:$0xff] }
 0x172   :  { %10744 = vmatprep.mubr.f32.mxu1 %v1427_v53 }
 0x175   :  { %10745 = vmatmul.mubr.f32.gmra.mrb[24].mxu1 %v12222_v52  ;;  %v12387_v52 = vpack.c.bf16 %v4109_v51, %v4108_v50  ;;  %v11803_v50 = vld [vmem:[%s12963_s1 + $0x8] sm:$0xff]  ;;  %v11804_v51 = vld [vmem:[%s12963_s1 + $0x10] sm:$0xff] }
 0x176   :  { %10747 = vmatprep.mubr.f32.mxu1 %v1437_v55 }
 0x179   :  { %10748 = vmatmul.mubr.f32.gmra.mrb[26].mxu1 %v10613_v54 }
 0x17a   :  { %10750 = vmatprep.mubr.f32.mxu1 %v1447_v57 }
 0x17d   :  { %10751 = vmatmul.mubr.f32.gmra.mrb[28].mxu1 %v10616_v56  ;;  %v12545_v56 = vld [vmem:[%s12965_s3 + $0x40] sm:$0xff] }
 0x17e   :  { %10753 = vmatprep.mubr.f32.mxu1 %v1457_v59 }
 0x181   :  { %10754 = vmatmul.mubr.f32.gmra.mrb[30].mxu1 %v10619_v58  ;;  %v12554_v58 = vld [vmem:[%s12965_s3 + $0x48] sm:$0xff] }
 0x182   :  { %10763 = vmatprep.mubr.msk.f32.mxu1 %vm66_vm0, %v12288_v60 }
 0x238   :  { %v10734_v61 = vpop.f32.mrb[16].mxu1 }
 0x239   :  { %v2773_v63 = vpop.f32.mrb[17].mxu1  ;;  %10761 = vmatprep.subr.mxu1 %v10734_v61 }
 0x23a   :  { %10756 = vmatprep.subr.mxu0 %v2773_v63  ;;  %10762 = vmatpush3.msra.mxu1 %v10734_v61 }
 0x23b   :  { %10757 = vmatpush3.msra.mxu0 %v2773_v63  ;;  %10764 = vmatmul.mubr.msk.f32.vlgmr.msra.gmra.mrb[0].mxu1 %vm66_vm0, %v12297_v62 }
 0x23c   :  { %v10737_v1 = vpop.f32.mrb[18].mxu1  ;;  %10759 = vmatmul.mubr.msk.f32.vlgmr.msra.gmra.mrb[0].mxu0 %vm66_vm0, %v12297_v62  ;;  %10773 = vmatprep.mubr.msk.f32.mxu1 %vm66_vm0, %v12288_v60 }
 0x23d   :  { %v2783_v2 = vpop.f32.mrb[19].mxu1  ;;  %10771 = vmatprep.subr.mxu1 %v10737_v1  ;;  %10768 = vmatprep.mubr.msk.f32.mxu0 %vm66_vm0, %v12288_v60 }
 0x23e   :  { %10766 = vmatprep.subr.mxu0 %v2783_v2  ;;  %10772 = vmatpush3.msra.mxu1 %v10737_v1 }
 0x23f   :  { %10767 = vmatpush3.msra.mxu0 %v2783_v2  ;;  %10774 = vmatmul.mubr.msk.f32.vlgmr.msra.gmra.mrb[2].mxu1 %vm66_vm0, %v12297_v62 }
 0x240   :  { %v10740_v14 = vpop.f32.mrb[20].mxu1  ;;  %10769 = vmatmul.mubr.msk.f32.vlgmr.msra.gmra.mrb[2].mxu0 %vm66_vm0, %v12297_v62  ;;  %10783 = vmatprep.mubr.msk.f32.mxu1 %vm66_vm0, %v12288_v60 }
 0x241   :  { %v2793_v15 = vpop.f32.mrb[21].mxu1  ;;  %10781 = vmatprep.subr.mxu1 %v10740_v14  ;;  %10778 = vmatprep.mubr.msk.f32.mxu0 %vm66_vm0, %v12288_v60 }
 0x242   :  { %10776 = vmatprep.subr.mxu0 %v2793_v15  ;;  %10782 = vmatpush3.msra.mxu1 %v10740_v14 }
 0x243   :  { %10777 = vmatpush3.msra.mxu0 %v2793_v15  ;;  %10784 = vmatmul.mubr.msk.f32.vlgmr.msra.gmra.mrb[4].mxu1 %vm66_vm0, %v12297_v62 }
 0x244   :  { %v10743_v17 = vpop.f32.mrb[22].mxu1  ;;  %10779 = vmatmul.mubr.msk.f32.vlgmr.msra.gmra.mrb[4].mxu0 %vm66_vm0, %v12297_v62  ;;  %10793 = vmatprep.mubr.msk.f32.mxu1 %vm66_vm0, %v12288_v60 }
 0x245   :  { %v2803_v18 = vpop.f32.mrb[23].mxu1  ;;  %10791 = vmatprep.subr.mxu1 %v10743_v17  ;;  %10788 = vmatprep.mubr.msk.f32.mxu0 %vm66_vm0, %v12288_v60 }
 0x246   :  { %10786 = vmatprep.subr.mxu0 %v2803_v18  ;;  %10792 = vmatpush3.msra.mxu1 %v10743_v17 }
 0x247   :  { %10787 = vmatpush3.msra.mxu0 %v2803_v18  ;;  %10794 = vmatmul.mubr.msk.f32.vlgmr.msra.gmra.mrb[6].mxu1 %vm66_vm0, %v12297_v62 }
 0x248   :  { %v10746_v19 = vpop.f32.mrb[24].mxu1  ;;  %10789 = vmatmul.mubr.msk.f32.vlgmr.msra.gmra.mrb[6].mxu0 %vm66_vm0, %v12297_v62  ;;  %10803 = vmatprep.mubr.msk.f32.mxu1 %vm66_vm0, %v12288_v60 }
 0x249   :  { %v2813_v21 = vpop.f32.mrb[25].mxu1  ;;  %10801 = vmatprep.subr.mxu1 %v10746_v19  ;;  %10798 = vmatprep.mubr.msk.f32.mxu0 %vm66_vm0, %v12288_v60 }
 0x24a   :  { %10796 = vmatprep.subr.mxu0 %v2813_v21  ;;  %10802 = vmatpush3.msra.mxu1 %v10746_v19 }
 0x24b   :  { %10797 = vmatpush3.msra.mxu0 %v2813_v21  ;;  %10804 = vmatmul.mubr.msk.f32.vlgmr.msra.gmra.mrb[8].mxu1 %vm66_vm0, %v12297_v62 }
 0x24c   :  { %v10749_v22 = vpop.f32.mrb[26].mxu1  ;;  %10799 = vmatmul.mubr.msk.f32.vlgmr.msra.gmra.mrb[8].mxu0 %vm66_vm0, %v12297_v62  ;;  %10813 = vmatprep.mubr.msk.f32.mxu1 %vm66_vm0, %v12288_v60 }
 0x24d   :  { %v2823_v23 = vpop.f32.mrb[27].mxu1  ;;  %10811 = vmatprep.subr.mxu1 %v10749_v22  ;;  %10808 = vmatprep.mubr.msk.f32.mxu0 %vm66_vm0, %v12288_v60 }
 0x24e   :  { %10806 = vmatprep.subr.mxu0 %v2823_v23  ;;  %10812 = vmatpush3.msra.mxu1 %v10749_v22  ;;  %v6883_v22 = vld [vmem:[#allocation3 + $0x100] sm:$0xff] }
 0x24f   :  { %10807 = vmatpush3.msra.mxu0 %v2823_v23  ;;  %10814 = vmatmul.mubr.msk.f32.vlgmr.msra.gmra.mrb[10].mxu1 %vm66_vm0, %v12297_v62  ;;  %v6884_v23 = vld [vmem:[#allocation3 + $0x108] sm:$0xff] }
 0x250   :  { %v10752_v25 = vpop.f32.mrb[28].mxu1  ;;  %10809 = vmatmul.mubr.msk.f32.vlgmr.msra.gmra.mrb[10].mxu0 %vm66_vm0, %v12297_v62  ;;  %10823 = vmatprep.mubr.msk.f32.mxu1 %vm66_vm0, %v12288_v60  ;;  %v12608_v29 = vpack.c.bf16 %v6884_v23, %v6883_v22  ;;  %v12849_v23 = vld [vmem:[%s12965_s3 + $0x68] sm:$0xff] }
 0x251   :  { %v2833_v26 = vpop.f32.mrb[29].mxu1  ;;  %10821 = vmatprep.subr.mxu1 %v10752_v25  ;;  %10818 = vmatprep.mubr.msk.f32.mxu0 %vm66_vm0, %v12288_v60 }
 0x252   :  { %10816 = vmatprep.subr.mxu0 %v2833_v26  ;;  %10822 = vmatpush3.msra.mxu1 %v10752_v25  ;;  %v6885_v25 = vld [vmem:[#allocation3 + $0x110] sm:$0xff] }
 0x253   :  { %10817 = vmatpush3.msra.mxu0 %v2833_v26  ;;  %10824 = vmatmul.mubr.msk.f32.vlgmr.msra.gmra.mrb[12].mxu1 %vm66_vm0, %v12297_v62  ;;  %v6886_v26 = vld [vmem:[#allocation3 + $0x118] sm:$0xff] }
 0x254   :  { %v10755_v32 = vpop.f32.mrb[30].mxu1  ;;  %10819 = vmatmul.mubr.msk.f32.vlgmr.msra.gmra.mrb[12].mxu0 %vm66_vm0, %v12297_v62  ;;  %10833 = vmatprep.mubr.msk.f32.mxu1 %vm66_vm0, %v12288_v60  ;;  %v12614_v31 = vpack.c.bf16 %v6886_v26, %v6885_v25 }
 0x255   :  { %v2843_v34 = vpop.f32.mrb[31].mxu1  ;;  %10831 = vmatprep.subr.mxu1 %v10755_v32  ;;  %10828 = vmatprep.mubr.msk.f32.mxu0 %vm66_vm0, %v12288_v60 }
 0x256   :  { %10826 = vmatprep.subr.mxu0 %v2843_v34  ;;  %10832 = vmatpush3.msra.mxu1 %v10755_v32  ;;  %v6887_v32 = vld [vmem:[#allocation3 + $0x120] sm:$0xff] }
 0x257   :  { %10827 = vmatpush3.msra.mxu0 %v2843_v34  ;;  %10834 = vmatmul.mubr.msk.f32.vlgmr.msra.gmra.mrb[14].mxu1 %vm66_vm0, %v12297_v62  ;;  %v11802_v34 = vld [vmem:[%s12963_s1] sm:$0xff] }
 0x258   :  { %11445 = vmatprep.subr.bf16.mxu0 %v12351_v33  ;;  %10829 = vmatmul.mubr.msk.f32.vlgmr.msra.gmra.mrb[14].mxu0 %vm66_vm0, %v12297_v62 }
 0x259   :  { %11447 = vmatpush3.bf16.msra.mxu0 %v12351_v33  ;;  %10868 = vmatprep.mubr.f32.mxu0 %v11919_v0  ;;  %v4104_v0 = vld [vmem:[#allocation3 + $0xd0] sm:$0xff] }
 0x25a   :  { %11449 = vmatprep.subr.bf16.mxu0 %v12357_v35  ;;  %v12379_v46 = vpack.c.bf16 %v4105_v45, %v4104_v0  ;;  %v6895_v0 = vld [vmem:[#allocation3 + $0x160] sm:$0xff]  ;;  %v6896_v45 = vld [vmem:[#allocation3 + $0x168] sm:$0xff] }
 0x25d   :  { %11451 = vmatpush3.bf16.msra.mxu0 %v12357_v35 }
 0x25e   :  { %11453 = vmatprep.subr.bf16.mxu0 %v12367_v38 }
 0x261   :  { %11455 = vmatpush3.bf16.msra.mxu0 %v12367_v38 }
 0x262   :  { %11457 = vmatprep.subr.bf16.mxu0 %v12371_v41 }
 0x265   :  { %11459 = vmatpush3.bf16.msra.mxu0 %v12371_v41 }
 0x266   :  { %11461 = vmatprep.subr.bf16.mxu0 %v12375_v44 }
 0x269   :  { %11463 = vmatpush3.bf16.msra.mxu0 %v12375_v44 }
 0x26a   :  { %11465 = vmatprep.subr.bf16.mxu0 %v12379_v46 }
 0x26d   :  { %11467 = vmatpush3.bf16.msra.mxu0 %v12379_v46 }
 0x26e   :  { %11469 = vmatprep.subr.bf16.mxu0 %v12383_v49 }
 0x271   :  { %11471 = vmatpush3.bf16.msra.mxu0 %v12383_v49 }
 0x272   :  { %11473 = vmatprep.subr.bf16.mxu0 %v12387_v52 }
 0x275   :  { %11475 = vmatpush3.bf16.msra.mxu0 %v12387_v52 }
 0x278   :  { %10869 = vmatmul.mubr.f32.vlgmr.msra.gmra.mrb[32].mxu0 %v11967_v6 }
 0x279   :  { %10871 = vmatprep.mubr.f32.mxu0 %v11937_v3  ;;  %v12410_v3 = vld [vmem:[%s12965_s3 + $0x30] sm:$0xff] }
 0x27a   :  { %10899 = vmatprep.mubr.msk.f32.mxu1 %vm66_vm0, %v12410_v3 }
 0x27c   :  { %10872 = vmatmul.mubr.f32.gmra.mrb[34].mxu0 %v11987_v8 }
 0x27d   :  { %10874 = vmatprep.mubr.f32.mxu0 %v11943_v4 }
 0x280   :  { %10875 = vmatmul.mubr.f32.gmra.mrb[36].mxu0 %v12009_v10 }
 0x281   :  { %10877 = vmatprep.mubr.f32.mxu0 %v11957_v5  ;;  %v12421_v5 = vld [vmem:[%s12965_s3 + $0x38] sm:$0xff] }
 0x284   :  { %10878 = vmatmul.mubr.f32.gmra.mrb[38].mxu0 %v12031_v12 }
 0x285   :  { %10880 = vmatprep.mubr.f32.mxu0 %v11974_v7 }
 0x288   :  { %10881 = vmatmul.mubr.f32.gmra.mrb[40].mxu0 %v12053_v16 }
 0x289   :  { %10883 = vmatprep.mubr.f32.mxu0 %v11994_v9 }
 0x28c   :  { %10884 = vmatmul.mubr.f32.gmra.mrb[42].mxu0 %v12072_v20 }
 0x28d   :  { %10886 = vmatprep.mubr.f32.mxu0 %v12016_v11 }
 0x290   :  { %10887 = vmatmul.mubr.f32.gmra.mrb[44].mxu0 %v12090_v24 }
 0x291   :  { %10889 = vmatprep.mubr.f32.mxu0 %v12038_v13 }
 0x294   :  { %10890 = vmatmul.mubr.f32.gmra.mrb[46].mxu0 %v12099_v28 }
 0x295   :  { %10894 = vmatprep.mubr.msk.f32.mxu0 %vm66_vm0, %v12410_v3 }
 0x34b   :  { %v12416_v4 = vpop.f32.mrb[32].mxu0 }
 0x34c   :  { %v12423_v6 = vpop.f32.mrb[33].mxu0  ;;  %10897 = vmatprep.subr.mxu1 %v12416_v4 }
 0x34d   :  { %10892 = vmatprep.subr.mxu0 %v12423_v6  ;;  %10898 = vmatpush3.msra.mxu1 %v12416_v4 }
 0x34e   :  { %10893 = vmatpush3.msra.mxu0 %v12423_v6  ;;  %10900 = vmatmul.mubr.msk.f32.vlgmr.msra.gmra.mrb[0].mxu1 %vm66_vm0, %v12421_v5 }
 0x34f   :  { %v12431_v7 = vpop.f32.mrb[34].mxu0  ;;  %10909 = vmatprep.mubr.msk.f32.mxu1 %vm66_vm0, %v12410_v3  ;;  %10895 = vmatmul.mubr.msk.f32.vlgmr.msra.gmra.mrb[0].mxu0 %vm66_vm0, %v12421_v5 }
 0x350   :  { %v12437_v8 = vpop.f32.mrb[35].mxu0  ;;  %10907 = vmatprep.subr.mxu1 %v12431_v7  ;;  %10904 = vmatprep.mubr.msk.f32.mxu0 %vm66_vm0, %v12410_v3 }
 0x351   :  { %10902 = vmatprep.subr.mxu0 %v12437_v8  ;;  %10908 = vmatpush3.msra.mxu1 %v12431_v7 }
 0x352   :  { %10903 = vmatpush3.msra.mxu0 %v12437_v8  ;;  %10910 = vmatmul.mubr.msk.f32.vlgmr.msra.gmra.mrb[2].mxu1 %vm66_vm0, %v12421_v5 }
 0x353   :  { %v12447_v9 = vpop.f32.mrb[36].mxu0  ;;  %10919 = vmatprep.mubr.msk.f32.mxu1 %vm66_vm0, %v12410_v3  ;;  %10905 = vmatmul.mubr.msk.f32.vlgmr.msra.gmra.mrb[2].mxu0 %vm66_vm0, %v12421_v5 }
 0x354   :  { %v12453_v10 = vpop.f32.mrb[37].mxu0  ;;  %10917 = vmatprep.subr.mxu1 %v12447_v9  ;;  %10914 = vmatprep.mubr.msk.f32.mxu0 %vm66_vm0, %v12410_v3 }
 0x355   :  { %10912 = vmatprep.subr.mxu0 %v12453_v10  ;;  %10918 = vmatpush3.msra.mxu1 %v12447_v9 }
 0x356   :  { %10913 = vmatpush3.msra.mxu0 %v12453_v10  ;;  %10920 = vmatmul.mubr.msk.f32.vlgmr.msra.gmra.mrb[4].mxu1 %vm66_vm0, %v12421_v5 }
 0x357   :  { %v12463_v11 = vpop.f32.mrb[38].mxu0  ;;  %10929 = vmatprep.mubr.msk.f32.mxu1 %vm66_vm0, %v12410_v3  ;;  %10915 = vmatmul.mubr.msk.f32.vlgmr.msra.gmra.mrb[4].mxu0 %vm66_vm0, %v12421_v5 }
 0x358   :  { %v12469_v12 = vpop.f32.mrb[39].mxu0  ;;  %10927 = vmatprep.subr.mxu1 %v12463_v11  ;;  %10924 = vmatprep.mubr.msk.f32.mxu0 %vm66_vm0, %v12410_v3 }
 0x359   :  { %10922 = vmatprep.subr.mxu0 %v12469_v12  ;;  %10928 = vmatpush3.msra.mxu1 %v12463_v11 }
 0x35a   :  { %10923 = vmatpush3.msra.mxu0 %v12469_v12  ;;  %10930 = vmatmul.mubr.msk.f32.vlgmr.msra.gmra.mrb[6].mxu1 %vm66_vm0, %v12421_v5 }
 0x35b   :  { %v12479_v13 = vpop.f32.mrb[40].mxu0  ;;  %10939 = vmatprep.mubr.msk.f32.mxu1 %vm66_vm0, %v12410_v3  ;;  %10925 = vmatmul.mubr.msk.f32.vlgmr.msra.gmra.mrb[6].mxu0 %vm66_vm0, %v12421_v5 }
 0x35c   :  { %v4216_v16 = vpop.f32.mrb[41].mxu0  ;;  %10937 = vmatprep.subr.mxu1 %v12479_v13  ;;  %10934 = vmatprep.mubr.msk.f32.mxu0 %vm66_vm0, %v12410_v3 }
 0x35d   :  { %10932 = vmatprep.subr.mxu0 %v4216_v16  ;;  %10938 = vmatpush3.msra.mxu1 %v12479_v13 }
 0x35e   :  { %10933 = vmatpush3.msra.mxu0 %v4216_v16  ;;  %10940 = vmatmul.mubr.msk.f32.vlgmr.msra.gmra.mrb[8].mxu1 %vm66_vm0, %v12421_v5 }
 0x35f   :  { %v10885_v20 = vpop.f32.mrb[42].mxu0  ;;  %10949 = vmatprep.mubr.msk.f32.mxu1 %vm66_vm0, %v12410_v3  ;;  %10935 = vmatmul.mubr.msk.f32.vlgmr.msra.gmra.mrb[8].mxu0 %vm66_vm0, %v12421_v5 }
 0x360   :  { %v4226_v24 = vpop.f32.mrb[43].mxu0  ;;  %10947 = vmatprep.subr.mxu1 %v10885_v20  ;;  %10944 = vmatprep.mubr.msk.f32.mxu0 %vm66_vm0, %v12410_v3 }
 0x361   :  { %10942 = vmatprep.subr.mxu0 %v4226_v24  ;;  %10948 = vmatpush3.msra.mxu1 %v10885_v20 }
 0x362   :  { %10943 = vmatpush3.msra.mxu0 %v4226_v24  ;;  %10950 = vmatmul.mubr.msk.f32.vlgmr.msra.gmra.mrb[10].mxu1 %vm66_vm0, %v12421_v5 }
 0x363   :  { %v10888_v28 = vpop.f32.mrb[44].mxu0  ;;  %10959 = vmatprep.mubr.msk.f32.mxu1 %vm66_vm0, %v12410_v3  ;;  %10945 = vmatmul.mubr.msk.f32.vlgmr.msra.gmra.mrb[10].mxu0 %vm66_vm0, %v12421_v5 }
 0x364   :  { %v4236_v53 = vpop.f32.mrb[45].mxu0  ;;  %10957 = vmatprep.subr.mxu1 %v10888_v28  ;;  %10954 = vmatprep.mubr.msk.f32.mxu0 %vm66_vm0, %v12410_v3 }
 0x365   :  { %10952 = vmatprep.subr.mxu0 %v4236_v53  ;;  %10958 = vmatpush3.msra.mxu1 %v10888_v28 }
 0x366   :  { %10953 = vmatpush3.msra.mxu0 %v4236_v53  ;;  %10960 = vmatmul.mubr.msk.f32.vlgmr.msra.gmra.mrb[12].mxu1 %vm66_vm0, %v12421_v5 }
 0x367   :  { %v10891_v54 = vpop.f32.mrb[46].mxu0  ;;  %10969 = vmatprep.mubr.msk.f32.mxu1 %vm66_vm0, %v12410_v3  ;;  %10955 = vmatmul.mubr.msk.f32.vlgmr.msra.gmra.mrb[12].mxu0 %vm66_vm0, %v12421_v5 }
 0x368   :  { %v4246_v55 = vpop.f32.mrb[47].mxu0  ;;  %10967 = vmatprep.subr.mxu1 %v10891_v54  ;;  %10964 = vmatprep.mubr.msk.f32.mxu0 %vm66_vm0, %v12410_v3  ;;  %v11806_v3 = vld [vmem:[%s12963_s1 + $0x20] sm:$0xff] }
 0x369   :  { %10962 = vmatprep.subr.mxu0 %v4246_v55  ;;  %10968 = vmatpush3.msra.mxu1 %v10891_v54 }
 0x36a   :  { %10963 = vmatpush3.msra.mxu0 %v4246_v55  ;;  %10970 = vmatmul.mubr.msk.f32.vlgmr.msra.gmra.mrb[14].mxu1 %vm66_vm0, %v12421_v5 }
 0x36b   :  { %11477 = vmatprep.subr.bf16.mxu1 %v12351_v33  ;;  %11004 = vmatprep.mubr.f32.mxu1 %v12423_v6  ;;  %v11809_v6 = vld [vmem:[%s12963_s1 + $0x38] sm:$0xff] }
 0x36c   :  { %11479 = vmatpush3.bf16.msra.mxu1 %v12351_v33  ;;  %10965 = vmatmul.mubr.msk.f32.vlgmr.msra.gmra.mrb[14].mxu0 %vm66_vm0, %v12421_v5  ;;  %v6888_v33 = vld [vmem:[#allocation3 + $0x128] sm:$0xff]  ;;  %v11808_v5 = vld [vmem:[%s12963_s1 + $0x30] sm:$0xff] }
 0x36d   :  { %11481 = vmatprep.subr.bf16.mxu1 %v12357_v35  ;;  %11030 = vmatprep.mubr.msk.f32.mxu0 %vm66_vm0, %v12545_v56 }
 0x370   :  { %11483 = vmatpush3.bf16.msra.mxu1 %v12357_v35  ;;  %v12626_v35 = vpack.c.bf16 %v6888_v33, %v6887_v32 }
 0x371   :  { %11485 = vmatprep.subr.bf16.mxu1 %v12367_v38 }
 0x374   :  { %11487 = vmatpush3.bf16.msra.mxu1 %v12367_v38  ;;  %v12630_v38 = vpack.c.bf16 %v6890_v37, %v6889_v36 }
 0x375   :  { %11489 = vmatprep.subr.bf16.mxu1 %v12371_v41 }
 0x378   :  { %11491 = vmatpush3.bf16.msra.mxu1 %v12371_v41  ;;  %v12634_v41 = vpack.c.bf16 %v6892_v40, %v6891_v39 }
 0x379   :  { %11493 = vmatprep.subr.bf16.mxu1 %v12375_v44 }
 0x37c   :  { %11495 = vmatpush3.bf16.msra.mxu1 %v12375_v44  ;;  %v12638_v44 = vpack.c.bf16 %v6894_v43, %v6893_v42 }
 0x37d   :  { %11497 = vmatprep.subr.bf16.mxu1 %v12379_v46 }
 0x380   :  { %11499 = vmatpush3.bf16.msra.mxu1 %v12379_v46  ;;  %v12642_v46 = vpack.c.bf16 %v6896_v45, %v6895_v0 }
 0x381   :  { %11501 = vmatprep.subr.bf16.mxu1 %v12383_v49 }
 0x384   :  { %11503 = vmatpush3.bf16.msra.mxu1 %v12383_v49  ;;  %v12646_v49 = vpack.c.bf16 %v6898_v48, %v6897_v47 }
 0x385   :  { %11505 = vmatprep.subr.bf16.mxu1 %v12387_v52 }
 0x388   :  { %11507 = vmatpush3.bf16.msra.mxu1 %v12387_v52  ;;  %v11805_v52 = vld [vmem:[%s12963_s1 + $0x18] sm:$0xff] }
 0x38b   :  { %11005 = vmatmul.mubr.f32.vlgmr.msra.gmra.mrb[32].mxu1 %v12416_v4  ;;  %v11807_v4 = vld [vmem:[%s12963_s1 + $0x28] sm:$0xff] }
 0x38c   :  { %11007 = vmatprep.mubr.f32.mxu1 %v12437_v8  ;;  %v11811_v8 = vld [vmem:[%s12963_s1 + $0x48] sm:$0xff] }
 0x38f   :  { %11008 = vmatmul.mubr.f32.gmra.mrb[34].mxu1 %v12431_v7  ;;  %v11810_v7 = vld [vmem:[%s12963_s1 + $0x40] sm:$0xff] }
 0x390   :  { %11010 = vmatprep.mubr.f32.mxu1 %v12453_v10  ;;  %v11813_v10 = vld [vmem:[%s12963_s1 + $0x58] sm:$0xff] }
 0x393   :  { %11011 = vmatmul.mubr.f32.gmra.mrb[36].mxu1 %v12447_v9  ;;  %v11812_v9 = vld [vmem:[%s12963_s1 + $0x50] sm:$0xff] }
 0x394   :  { %11013 = vmatprep.mubr.f32.mxu1 %v12469_v12  ;;  %v11815_v12 = vld [vmem:[%s12963_s1 + $0x68] sm:$0xff] }
 0x397   :  { %11014 = vmatmul.mubr.f32.gmra.mrb[38].mxu1 %v12463_v11  ;;  %v11814_v11 = vld [vmem:[%s12963_s1 + $0x60] sm:$0xff] }
 0x398   :  { %11016 = vmatprep.mubr.f32.mxu1 %v4216_v16  ;;  %v11817_v16 = vld [vmem:[%s12963_s1 + $0x78] sm:$0xff] }
 0x39b   :  { %11017 = vmatmul.mubr.f32.gmra.mrb[40].mxu1 %v12479_v13  ;;  %v11816_v13 = vld [vmem:[%s12963_s1 + $0x70] sm:$0xff] }
 0x39c   :  { %11019 = vmatprep.mubr.f32.mxu1 %v4226_v24 }
 0x39f   :  { %11020 = vmatmul.mubr.f32.gmra.mrb[42].mxu1 %v10885_v20  ;;  %v12699_v20 = vld [vmem:[%s12965_s3 + $0x50] sm:$0xff] }
 0x3a0   :  { %11022 = vmatprep.mubr.f32.mxu1 %v4236_v53 }
 0x3a3   :  { %11023 = vmatmul.mubr.f32.gmra.mrb[44].mxu1 %v10888_v28  ;;  %v12710_v28 = vld [vmem:[%s12965_s3 + $0x58] sm:$0xff] }
 0x3a4   :  { %11025 = vmatprep.mubr.f32.mxu1 %v4246_v55 }
 0x3a7   :  { %11026 = vmatmul.mubr.f32.gmra.mrb[46].mxu1 %v10891_v54 }
 0x3a8   :  { %11035 = vmatprep.mubr.msk.f32.mxu1 %vm66_vm0, %v12545_v56 }
 0x45e   :  { %v11006_v57 = vpop.f32.mrb[32].mxu1 }
 0x45f   :  { %v5562_v59 = vpop.f32.mrb[33].mxu1  ;;  %11033 = vmatprep.subr.mxu1 %v11006_v57 }
 0x460   :  { %11028 = vmatprep.subr.mxu0 %v5562_v59  ;;  %11034 = vmatpush3.msra.mxu1 %v11006_v57 }
 0x461   :  { %11029 = vmatpush3.msra.mxu0 %v5562_v59  ;;  %11036 = vmatmul.mubr.msk.f32.vlgmr.msra.gmra.mrb[0].mxu1 %vm66_vm0, %v12554_v58 }
 0x462   :  { %v11009_v60 = vpop.f32.mrb[34].mxu1  ;;  %11031 = vmatmul.mubr.msk.f32.vlgmr.msra.gmra.mrb[0].mxu0 %vm66_vm0, %v12554_v58  ;;  %11045 = vmatprep.mubr.msk.f32.mxu1 %vm66_vm0, %v12545_v56 }
 0x463   :  { %v5572_v61 = vpop.f32.mrb[35].mxu1  ;;  %11043 = vmatprep.subr.mxu1 %v11009_v60  ;;  %11040 = vmatprep.mubr.msk.f32.mxu0 %vm66_vm0, %v12545_v56 }
 0x464   :  { %11038 = vmatprep.subr.mxu0 %v5572_v61  ;;  %11044 = vmatpush3.msra.mxu1 %v11009_v60 }
 0x465   :  { %11039 = vmatpush3.msra.mxu0 %v5572_v61  ;;  %11046 = vmatmul.mubr.msk.f32.vlgmr.msra.gmra.mrb[2].mxu1 %vm66_vm0, %v12554_v58 }
 0x466   :  { %v11012_v62 = vpop.f32.mrb[36].mxu1  ;;  %11041 = vmatmul.mubr.msk.f32.vlgmr.msra.gmra.mrb[2].mxu0 %vm66_vm0, %v12554_v58  ;;  %11055 = vmatprep.mubr.msk.f32.mxu1 %vm66_vm0, %v12545_v56 }
 0x467   :  { %v5582_v63 = vpop.f32.mrb[37].mxu1  ;;  %11053 = vmatprep.subr.mxu1 %v11012_v62  ;;  %11050 = vmatprep.mubr.msk.f32.mxu0 %vm66_vm0, %v12545_v56 }
 0x468   :  { %11048 = vmatprep.subr.mxu0 %v5582_v63  ;;  %11054 = vmatpush3.msra.mxu1 %v11012_v62 }
 0x469   :  { %11049 = vmatpush3.msra.mxu0 %v5582_v63  ;;  %11056 = vmatmul.mubr.msk.f32.vlgmr.msra.gmra.mrb[4].mxu1 %vm66_vm0, %v12554_v58 }
 0x46a   :  { %v11015_v1 = vpop.f32.mrb[38].mxu1  ;;  %11051 = vmatmul.mubr.msk.f32.vlgmr.msra.gmra.mrb[4].mxu0 %vm66_vm0, %v12554_v58  ;;  %11065 = vmatprep.mubr.msk.f32.mxu1 %vm66_vm0, %v12545_v56 }
 0x46b   :  { %v5592_v2 = vpop.f32.mrb[39].mxu1  ;;  %11063 = vmatprep.subr.mxu1 %v11015_v1  ;;  %11060 = vmatprep.mubr.msk.f32.mxu0 %vm66_vm0, %v12545_v56 }
 0x46c   :  { %11058 = vmatprep.subr.mxu0 %v5592_v2  ;;  %11064 = vmatpush3.msra.mxu1 %v11015_v1 }
 0x46d   :  { %11059 = vmatpush3.msra.mxu0 %v5592_v2  ;;  %11066 = vmatmul.mubr.msk.f32.vlgmr.msra.gmra.mrb[6].mxu1 %vm66_vm0, %v12554_v58 }
 0x46e   :  { %v11018_v14 = vpop.f32.mrb[40].mxu1  ;;  %11061 = vmatmul.mubr.msk.f32.vlgmr.msra.gmra.mrb[6].mxu0 %vm66_vm0, %v12554_v58  ;;  %11075 = vmatprep.mubr.msk.f32.mxu1 %vm66_vm0, %v12545_v56 }
 0x46f   :  { %v5602_v15 = vpop.f32.mrb[41].mxu1  ;;  %11073 = vmatprep.subr.mxu1 %v11018_v14  ;;  %11070 = vmatprep.mubr.msk.f32.mxu0 %vm66_vm0, %v12545_v56 }
 0x470   :  { %11068 = vmatprep.subr.mxu0 %v5602_v15  ;;  %11074 = vmatpush3.msra.mxu1 %v11018_v14 }
 0x471   :  { %11069 = vmatpush3.msra.mxu0 %v5602_v15  ;;  %11076 = vmatmul.mubr.msk.f32.vlgmr.msra.gmra.mrb[8].mxu1 %vm66_vm0, %v12554_v58 }
 0x472   :  { %v11021_v17 = vpop.f32.mrb[42].mxu1  ;;  %11071 = vmatmul.mubr.msk.f32.vlgmr.msra.gmra.mrb[8].mxu0 %vm66_vm0, %v12554_v58  ;;  %11085 = vmatprep.mubr.msk.f32.mxu1 %vm66_vm0, %v12545_v56 }
 0x473   :  { %v5612_v18 = vpop.f32.mrb[43].mxu1  ;;  %11083 = vmatprep.subr.mxu1 %v11021_v17  ;;  %11080 = vmatprep.mubr.msk.f32.mxu0 %vm66_vm0, %v12545_v56 }
 0x474   :  { %11078 = vmatprep.subr.mxu0 %v5612_v18  ;;  %11084 = vmatpush3.msra.mxu1 %v11021_v17  ;;  %v12834_v17 = vld [vmem:[%s12965_s3 + $0x60] sm:$0xff]  ;;  %s11870_s3 = smov [#allocation6]  }
 0x475   :  { %11079 = vmatpush3.msra.mxu0 %v5612_v18  ;;  %11086 = vmatmul.mubr.msk.f32.vlgmr.msra.gmra.mrb[10].mxu1 %vm66_vm0, %v12554_v58  ;;  %v52_v18 = vld [vmem:[%s12966_s4] sm:$0xff] }
 0x476   :  { %v11024_v19 = vpop.f32.mrb[44].mxu1  ;;  %11081 = vmatmul.mubr.msk.f32.vlgmr.msra.gmra.mrb[10].mxu0 %vm66_vm0, %v12554_v58  ;;  %11095 = vmatprep.mubr.msk.f32.mxu1 %vm66_vm0, %v12545_v56 }
 0x477   :  { %v5622_v21 = vpop.f32.mrb[45].mxu1  ;;  %11093 = vmatprep.subr.mxu1 %v11024_v19  ;;  %11090 = vmatprep.mubr.msk.f32.mxu0 %vm66_vm0, %v12545_v56 }
 0x478   :  { %11088 = vmatprep.subr.mxu0 %v5622_v21  ;;  %11094 = vmatpush3.msra.mxu1 %v11024_v19  ;;  %v11869_v19 = vmov 0  }
 0x479   :  { %11089 = vmatpush3.msra.mxu0 %v5622_v21  ;;  %11096 = vmatmul.mubr.msk.f32.vlgmr.msra.gmra.mrb[12].mxu1 %vm66_vm0, %v12554_v58  ;;  %v53_v21 = vld [vmem:[%s12966_s4 + $0x8] sm:$0xff]  ;;  %s9708_s4 = sshll.u32 %s11870_s3, 4  ;;  %s9709_s4 = int_to_ptr.vmem [resolvable:$true] %s9708_s4 }
 0x47a   :  { %v11027_v27 = vpop.f32.mrb[46].mxu1  ;;  %11091 = vmatmul.mubr.msk.f32.vlgmr.msra.gmra.mrb[12].mxu0 %vm66_vm0, %v12554_v58  ;;  %11105 = vmatprep.mubr.msk.f32.mxu1 %vm66_vm0, %v12545_v56  ;;  %s11840_s24 = scalar_lea.vmem %s9709_s4, 4096  ;;  %p11845_p9 = scmp.lt.s32.totalorder %s9709_s4, %s9709_s4 }
 0x47b   :  { %v5632_v30 = vpop.f32.mrb[47].mxu1  ;;  %11103 = vmatprep.subr.mxu1 %v11027_v27  ;;  %11100 = vmatprep.mubr.msk.f32.mxu0 %vm66_vm0, %v12545_v56  ;;  %p11841_p8 = scmp.ne.s32.totalorder %s9709_s4, %s11840_s24  ;;  %p11846_p10 = scmp.lt.s32.totalorder %s11840_s24, %s11840_s24 }
 0x47c   :  { %11098 = vmatprep.subr.mxu0 %v5632_v30  ;;  %11104 = vmatpush3.msra.mxu1 %v11027_v27 }
 0x47d   :  { %11099 = vmatpush3.msra.mxu0 %v5632_v30  ;;  %11106 = vmatmul.mubr.msk.f32.vlgmr.msra.gmra.mrb[14].mxu1 %vm66_vm0, %v12554_v58  ;;  %p11847_p11 = por %p11846_p10, %p11845_p9 }
 0x47e   :  { %11509 = vmatprep.subr.bf16.mxu0 %v12608_v29  ;;  %11101 = vmatmul.mubr.msk.f32.vlgmr.msra.gmra.mrb[14].mxu0 %vm66_vm0, %v12554_v58 }
 0x47f   :  { %11511 = vmatpush3.bf16.msra.mxu0 %v12608_v29  ;;  %11140 = vmatprep.mubr.f32.mxu0 %v11802_v34  ;;  %p11848_p12 = pnand %p11847_p11, %p11841_p8 }
 0x480   :  { %11513 = vmatprep.subr.bf16.mxu0 %v12614_v31  ;;  %11171 = vmatprep.mubr.msk.f32.mxu1 %vm66_vm0, %v12699_v20 }
 0x481   :  { %11801 = vset.pattern.permute.xlu0 %v11869_v19 }
 0x482   :  { %56 = vperm.xlu0 %11801, %v52_v18  }
 0x483   :  { %11515 = vmatpush3.bf16.msra.mxu0 %v12614_v31 }
 0x484   :  { %11517 = vmatprep.subr.bf16.mxu0 %v12626_v35 }
 0x486   :  { %61 = vperm.xlu0 %11801, %v53_v21  }
 0x487   :  { %11519 = vmatpush3.bf16.msra.mxu0 %v12626_v35 }
 0x488   :  { %11521 = vmatprep.subr.bf16.mxu0 %v12630_v38 }
 0x48b   :  { %11523 = vmatpush3.bf16.msra.mxu0 %v12630_v38 }
 0x48c   :  { %11525 = vmatprep.subr.bf16.mxu0 %v12634_v41 }
 0x48f   :  { %11527 = vmatpush3.bf16.msra.mxu0 %v12634_v41 }
 0x490   :  { %11529 = vmatprep.subr.bf16.mxu0 %v12638_v44 }
 0x493   :  { %11531 = vmatpush3.bf16.msra.mxu0 %v12638_v44 }
 0x494   :  { %11533 = vmatprep.subr.bf16.mxu0 %v12642_v46 }
 0x497   :  { %11535 = vmatpush3.bf16.msra.mxu0 %v12642_v46 }
 0x498   :  { %11537 = vmatprep.subr.bf16.mxu0 %v12646_v49 }
 0x49b   :  { %11539 = vmatpush3.bf16.msra.mxu0 %v12646_v49 }
 0x49e   :  { %11141 = vmatmul.mubr.f32.vlgmr.msra.gmra.mrb[48].mxu0 %v11803_v50 }
 0x49f   :  { %11143 = vmatprep.mubr.f32.mxu0 %v11804_v51 }
 0x4a2   :  { %11144 = vmatmul.mubr.f32.gmra.mrb[50].mxu0 %v11805_v52 }
 0x4a3   :  { %11146 = vmatprep.mubr.f32.mxu0 %v11806_v3 }
 0x4a6   :  { %11147 = vmatmul.mubr.f32.gmra.mrb[52].mxu0 %v11807_v4 }
 0x4a7   :  { %11149 = vmatprep.mubr.f32.mxu0 %v11808_v5 }
 0x4aa   :  { %11150 = vmatmul.mubr.f32.gmra.mrb[54].mxu0 %v11809_v6 }
 0x4ab   :  { %11152 = vmatprep.mubr.f32.mxu0 %v11810_v7 }
 0x4ae   :  { %11153 = vmatmul.mubr.f32.gmra.mrb[56].mxu0 %v11811_v8 }
 0x4af   :  { %11155 = vmatprep.mubr.f32.mxu0 %v11812_v9 }
 0x4b2   :  { %11156 = vmatmul.mubr.f32.gmra.mrb[58].mxu0 %v11813_v10 }
 0x4b3   :  { %11158 = vmatprep.mubr.f32.mxu0 %v11814_v11 }
 0x4b6   :  { %11159 = vmatmul.mubr.f32.gmra.mrb[60].mxu0 %v11815_v12 }
 0x4b7   :  { %11161 = vmatprep.mubr.f32.mxu0 %v11816_v13 }
 0x4ba   :  { %11162 = vmatmul.mubr.f32.gmra.mrb[62].mxu0 %v11817_v16 }
 0x4bb   :  { %11166 = vmatprep.mubr.msk.f32.mxu0 %vm66_vm0, %v12699_v20 }
 0x571   :  { %v12705_v24 = vpop.f32.mrb[48].mxu0 }
 0x572   :  { %v12712_v53 = vpop.f32.mrb[49].mxu0  ;;  %11169 = vmatprep.subr.mxu1 %v12705_v24 }
 0x573   :  { %11164 = vmatprep.subr.mxu0 %v12712_v53  ;;  %11170 = vmatpush3.msra.mxu1 %v12705_v24 }
 0x574   :  { %11165 = vmatpush3.msra.mxu0 %v12712_v53  ;;  %11172 = vmatmul.mubr.msk.f32.vlgmr.msra.gmra.mrb[0].mxu1 %vm66_vm0, %v12710_v28 }
 0x575   :  { %v12720_v54 = vpop.f32.mrb[50].mxu0  ;;  %11181 = vmatprep.mubr.msk.f32.mxu1 %vm66_vm0, %v12699_v20  ;;  %11167 = vmatmul.mubr.msk.f32.vlgmr.msra.gmra.mrb[0].mxu0 %vm66_vm0, %v12710_v28 }
 0x576   :  { %v12726_v55 = vpop.f32.mrb[51].mxu0  ;;  %11179 = vmatprep.subr.mxu1 %v12720_v54  ;;  %11176 = vmatprep.mubr.msk.f32.mxu0 %vm66_vm0, %v12699_v20 }
 0x577   :  { %11174 = vmatprep.subr.mxu0 %v12726_v55  ;;  %11180 = vmatpush3.msra.mxu1 %v12720_v54 }
 0x578   :  { %11175 = vmatpush3.msra.mxu0 %v12726_v55  ;;  %11182 = vmatmul.mubr.msk.f32.vlgmr.msra.gmra.mrb[2].mxu1 %vm66_vm0, %v12710_v28 }
 0x579   :  { %v12736_v56 = vpop.f32.mrb[52].mxu0  ;;  %11191 = vmatprep.mubr.msk.f32.mxu1 %vm66_vm0, %v12699_v20  ;;  %11177 = vmatmul.mubr.msk.f32.vlgmr.msra.gmra.mrb[2].mxu0 %vm66_vm0, %v12710_v28 }
 0x57a   :  { %v12742_v57 = vpop.f32.mrb[53].mxu0  ;;  %11189 = vmatprep.subr.mxu1 %v12736_v56  ;;  %11186 = vmatprep.mubr.msk.f32.mxu0 %vm66_vm0, %v12699_v20 }
 0x57b   :  { %11184 = vmatprep.subr.mxu0 %v12742_v57  ;;  %11190 = vmatpush3.msra.mxu1 %v12736_v56 }
 0x57c   :  { %11185 = vmatpush3.msra.mxu0 %v12742_v57  ;;  %11192 = vmatmul.mubr.msk.f32.vlgmr.msra.gmra.mrb[4].mxu1 %vm66_vm0, %v12710_v28 }
 0x57d   :  { %v12752_v58 = vpop.f32.mrb[54].mxu0  ;;  %11201 = vmatprep.mubr.msk.f32.mxu1 %vm66_vm0, %v12699_v20  ;;  %11187 = vmatmul.mubr.msk.f32.vlgmr.msra.gmra.mrb[4].mxu0 %vm66_vm0, %v12710_v28 }
 0x57e   :  { %v12758_v59 = vpop.f32.mrb[55].mxu0  ;;  %11199 = vmatprep.subr.mxu1 %v12752_v58  ;;  %11196 = vmatprep.mubr.msk.f32.mxu0 %vm66_vm0, %v12699_v20 }
 0x57f   :  { %11194 = vmatprep.subr.mxu0 %v12758_v59  ;;  %11200 = vmatpush3.msra.mxu1 %v12752_v58 }
 0x580   :  { %11195 = vmatpush3.msra.mxu0 %v12758_v59  ;;  %11202 = vmatmul.mubr.msk.f32.vlgmr.msra.gmra.mrb[6].mxu1 %vm66_vm0, %v12710_v28 }
 0x581   :  { %v12768_v60 = vpop.f32.mrb[56].mxu0  ;;  %11211 = vmatprep.mubr.msk.f32.mxu1 %vm66_vm0, %v12699_v20  ;;  %11197 = vmatmul.mubr.msk.f32.vlgmr.msra.gmra.mrb[6].mxu0 %vm66_vm0, %v12710_v28 }
 0x582   :  { %v7005_v61 = vpop.f32.mrb[57].mxu0  ;;  %11209 = vmatprep.subr.mxu1 %v12768_v60  ;;  %11206 = vmatprep.mubr.msk.f32.mxu0 %vm66_vm0, %v12699_v20 }
 0x583   :  { %11204 = vmatprep.subr.mxu0 %v7005_v61  ;;  %11210 = vmatpush3.msra.mxu1 %v12768_v60 }
 0x584   :  { %11205 = vmatpush3.msra.mxu0 %v7005_v61  ;;  %11212 = vmatmul.mubr.msk.f32.vlgmr.msra.gmra.mrb[8].mxu1 %vm66_vm0, %v12710_v28 }
 0x585   :  { %v11157_v62 = vpop.f32.mrb[58].mxu0  ;;  %11221 = vmatprep.mubr.msk.f32.mxu1 %vm66_vm0, %v12699_v20  ;;  %11207 = vmatmul.mubr.msk.f32.vlgmr.msra.gmra.mrb[8].mxu0 %vm66_vm0, %v12710_v28 }
 0x586   :  { %v7015_v63 = vpop.f32.mrb[59].mxu0  ;;  %11219 = vmatprep.subr.mxu1 %v11157_v62  ;;  %11216 = vmatprep.mubr.msk.f32.mxu0 %vm66_vm0, %v12699_v20 }
 0x587   :  { %11214 = vmatprep.subr.mxu0 %v7015_v63  ;;  %11220 = vmatpush3.msra.mxu1 %v11157_v62 }
 0x588   :  { %11215 = vmatpush3.msra.mxu0 %v7015_v63  ;;  %11222 = vmatmul.mubr.msk.f32.vlgmr.msra.gmra.mrb[10].mxu1 %vm66_vm0, %v12710_v28 }
 0x589   :  { %v11160_v1 = vpop.f32.mrb[60].mxu0  ;;  %11231 = vmatprep.mubr.msk.f32.mxu1 %vm66_vm0, %v12699_v20  ;;  %11217 = vmatmul.mubr.msk.f32.vlgmr.msra.gmra.mrb[10].mxu0 %vm66_vm0, %v12710_v28 }
 0x58a   :  { %v7025_v2 = vpop.f32.mrb[61].mxu0  ;;  %11229 = vmatprep.subr.mxu1 %v11160_v1  ;;  %11226 = vmatprep.mubr.msk.f32.mxu0 %vm66_vm0, %v12699_v20 }
 0x58b   :  { %11224 = vmatprep.subr.mxu0 %v7025_v2  ;;  %11230 = vmatpush3.msra.mxu1 %v11160_v1 }
 0x58c   :  { %11225 = vmatpush3.msra.mxu0 %v7025_v2  ;;  %11232 = vmatmul.mubr.msk.f32.vlgmr.msra.gmra.mrb[12].mxu1 %vm66_vm0, %v12710_v28 }
 0x58d   :  { %v11163_v14 = vpop.f32.mrb[62].mxu0  ;;  %11241 = vmatprep.mubr.msk.f32.mxu1 %vm66_vm0, %v12699_v20  ;;  %11227 = vmatmul.mubr.msk.f32.vlgmr.msra.gmra.mrb[12].mxu0 %vm66_vm0, %v12710_v28 }
 0x58e   :  { %v7035_v15 = vpop.f32.mrb[63].mxu0  ;;  %11239 = vmatprep.subr.mxu1 %v11163_v14  ;;  %11236 = vmatprep.mubr.msk.f32.mxu0 %vm66_vm0, %v12699_v20 }
 0x58f   :  { %11234 = vmatprep.subr.mxu0 %v7035_v15  ;;  %11240 = vmatpush3.msra.mxu1 %v11163_v14 }
 0x590   :  { %11235 = vmatpush3.msra.mxu0 %v7035_v15  ;;  %11242 = vmatmul.mubr.msk.f32.vlgmr.msra.gmra.mrb[14].mxu1 %vm66_vm0, %v12710_v28 }
 0x591   :  { %11541 = vmatprep.subr.bf16.mxu1 %v12608_v29  ;;  %11276 = vmatprep.mubr.f32.mxu1 %v12712_v53 }
 0x592   :  { %11543 = vmatpush3.bf16.msra.mxu1 %v12608_v29  ;;  %11237 = vmatmul.mubr.msk.f32.vlgmr.msra.gmra.mrb[14].mxu0 %vm66_vm0, %v12710_v28 }
 0x593   :  { %11545 = vmatprep.subr.bf16.mxu1 %v12614_v31  ;;  %11302 = vmatprep.mubr.msk.f32.mxu0 %vm66_vm0, %v12834_v17 }
 0x596   :  { %11547 = vmatpush3.bf16.msra.mxu1 %v12614_v31 }
 0x597   :  { %11549 = vmatprep.subr.bf16.mxu1 %v12626_v35 }
 0x59a   :  { %11551 = vmatpush3.bf16.msra.mxu1 %v12626_v35 }
 0x59b   :  { %11553 = vmatprep.subr.bf16.mxu1 %v12630_v38 }
 0x59e   :  { %11555 = vmatpush3.bf16.msra.mxu1 %v12630_v38 }
 0x59f   :  { %11557 = vmatprep.subr.bf16.mxu1 %v12634_v41 }
 0x5a2   :  { %11559 = vmatpush3.bf16.msra.mxu1 %v12634_v41  ;;  %v12911_v41 = vpop.permute.xlu0 %56 }
 0x5a3   :  { %11561 = vmatprep.subr.bf16.mxu1 %v12638_v44 }
 0x5a6   :  { %11563 = vmatpush3.bf16.msra.mxu1 %v12638_v44  ;;  %v12913_v42 = vpop.permute.xlu0 %61 }
 0x5a7   :  { %11565 = vmatprep.subr.bf16.mxu1 %v12642_v46 }
 0x5aa   :  { %11567 = vmatpush3.bf16.msra.mxu1 %v12642_v46 }
 0x5ab   :  { %11569 = vmatprep.subr.bf16.mxu1 %v12646_v49 }
 0x5ae   :  { %11571 = vmatpush3.bf16.msra.mxu1 %v12646_v49 }
 0x5b1   :  { %11277 = vmatmul.mubr.f32.vlgmr.msra.gmra.mrb[48].mxu1 %v12705_v24 }
 0x5b2   :  { %11279 = vmatprep.mubr.f32.mxu1 %v12726_v55 }
 0x5b5   :  { %11280 = vmatmul.mubr.f32.gmra.mrb[50].mxu1 %v12720_v54 }
 0x5b6   :  { %11282 = vmatprep.mubr.f32.mxu1 %v12742_v57 }
 0x5b9   :  { %11283 = vmatmul.mubr.f32.gmra.mrb[52].mxu1 %v12736_v56 }
 0x5ba   :  { %11285 = vmatprep.mubr.f32.mxu1 %v12758_v59 }
 0x5bd   :  { %11286 = vmatmul.mubr.f32.gmra.mrb[54].mxu1 %v12752_v58 }
 0x5be   :  { %11288 = vmatprep.mubr.f32.mxu1 %v7005_v61 }
 0x5c1   :  { %11289 = vmatmul.mubr.f32.gmra.mrb[56].mxu1 %v12768_v60 }
 0x5c2   :  { %11291 = vmatprep.mubr.f32.mxu1 %v7015_v63 }
 0x5c5   :  { %11292 = vmatmul.mubr.f32.gmra.mrb[58].mxu1 %v11157_v62 }
 0x5c6   :  { %11294 = vmatprep.mubr.f32.mxu1 %v7025_v2 }
 0x5c9   :  { %11295 = vmatmul.mubr.f32.gmra.mrb[60].mxu1 %v11160_v1 }
 0x5ca   :  { %11297 = vmatprep.mubr.f32.mxu1 %v7035_v15 }
 0x5cd   :  { %11298 = vmatmul.mubr.f32.gmra.mrb[62].mxu1 %v11163_v14 }
 0x5ce   :  { %11307 = vmatprep.mubr.msk.f32.mxu1 %vm66_vm0, %v12834_v17 }
 0x684   :  { %v11278_v22 = vpop.f32.mrb[48].mxu1 }
 0x685   :  { %v8351_v25 = vpop.f32.mrb[49].mxu1  ;;  %11305 = vmatprep.subr.mxu1 %v11278_v22 }
 0x686   :  { %11300 = vmatprep.subr.mxu0 %v8351_v25  ;;  %11306 = vmatpush3.msra.mxu1 %v11278_v22 }
 0x687   :  { %11301 = vmatpush3.msra.mxu0 %v8351_v25  ;;  %11308 = vmatmul.mubr.msk.f32.vlgmr.msra.gmra.mrb[0].mxu1 %vm66_vm0, %v12849_v23 }
 0x688   :  { %v11281_v26 = vpop.f32.mrb[50].mxu1  ;;  %11303 = vmatmul.mubr.msk.f32.vlgmr.msra.gmra.mrb[0].mxu0 %vm66_vm0, %v12849_v23  ;;  %11317 = vmatprep.mubr.msk.f32.mxu1 %vm66_vm0, %v12834_v17 }
 0x689   :  { %v8361_v27 = vpop.f32.mrb[51].mxu1  ;;  %11315 = vmatprep.subr.mxu1 %v11281_v26  ;;  %11312 = vmatprep.mubr.msk.f32.mxu0 %vm66_vm0, %v12834_v17 }
 0x68a   :  { %11310 = vmatprep.subr.mxu0 %v8361_v27  ;;  %11316 = vmatpush3.msra.mxu1 %v11281_v26 }
 0x68b   :  { %11311 = vmatpush3.msra.mxu0 %v8361_v27  ;;  %11318 = vmatmul.mubr.msk.f32.vlgmr.msra.gmra.mrb[2].mxu1 %vm66_vm0, %v12849_v23 }
 0x68c   :  { %v11284_v29 = vpop.f32.mrb[52].mxu1  ;;  %11313 = vmatmul.mubr.msk.f32.vlgmr.msra.gmra.mrb[2].mxu0 %vm66_vm0, %v12849_v23  ;;  %11327 = vmatprep.mubr.msk.f32.mxu1 %vm66_vm0, %v12834_v17 }
 0x68d   :  { %v8371_v30 = vpop.f32.mrb[53].mxu1  ;;  %11325 = vmatprep.subr.mxu1 %v11284_v29  ;;  %11322 = vmatprep.mubr.msk.f32.mxu0 %vm66_vm0, %v12834_v17 }
 0x68e   :  { %11320 = vmatprep.subr.mxu0 %v8371_v30  ;;  %11326 = vmatpush3.msra.mxu1 %v11284_v29 }
 0x68f   :  { %11321 = vmatpush3.msra.mxu0 %v8371_v30  ;;  %11328 = vmatmul.mubr.msk.f32.vlgmr.msra.gmra.mrb[4].mxu1 %vm66_vm0, %v12849_v23 }
 0x690   :  { %v11287_v31 = vpop.f32.mrb[54].mxu1  ;;  %11323 = vmatmul.mubr.msk.f32.vlgmr.msra.gmra.mrb[4].mxu0 %vm66_vm0, %v12849_v23  ;;  %11337 = vmatprep.mubr.msk.f32.mxu1 %vm66_vm0, %v12834_v17 }
 0x691   :  { %v8381_v32 = vpop.f32.mrb[55].mxu1  ;;  %11335 = vmatprep.subr.mxu1 %v11287_v31  ;;  %11332 = vmatprep.mubr.msk.f32.mxu0 %vm66_vm0, %v12834_v17 }
 0x692   :  { %11330 = vmatprep.subr.mxu0 %v8381_v32  ;;  %11336 = vmatpush3.msra.mxu1 %v11287_v31 }
 0x693   :  { %11331 = vmatpush3.msra.mxu0 %v8381_v32  ;;  %11338 = vmatmul.mubr.msk.f32.vlgmr.msra.gmra.mrb[6].mxu1 %vm66_vm0, %v12849_v23 }
 0x694   :  { %v11290_v33 = vpop.f32.mrb[56].mxu1  ;;  %11333 = vmatmul.mubr.msk.f32.vlgmr.msra.gmra.mrb[6].mxu0 %vm66_vm0, %v12849_v23  ;;  %11347 = vmatprep.mubr.msk.f32.mxu1 %vm66_vm0, %v12834_v17 }
 0x695   :  { %v8391_v34 = vpop.f32.mrb[57].mxu1  ;;  %11345 = vmatprep.subr.mxu1 %v11290_v33  ;;  %11342 = vmatprep.mubr.msk.f32.mxu0 %vm66_vm0, %v12834_v17 }
 0x696   :  { %11340 = vmatprep.subr.mxu0 %v8391_v34  ;;  %11346 = vmatpush3.msra.mxu1 %v11290_v33 }
 0x697   :  { %11341 = vmatpush3.msra.mxu0 %v8391_v34  ;;  %11348 = vmatmul.mubr.msk.f32.vlgmr.msra.gmra.mrb[8].mxu1 %vm66_vm0, %v12849_v23 }
 0x698   :  { %v11293_v35 = vpop.f32.mrb[58].mxu1  ;;  %11343 = vmatmul.mubr.msk.f32.vlgmr.msra.gmra.mrb[8].mxu0 %vm66_vm0, %v12849_v23  ;;  %11357 = vmatprep.mubr.msk.f32.mxu1 %vm66_vm0, %v12834_v17 }
 0x699   :  { %v8401_v36 = vpop.f32.mrb[59].mxu1  ;;  %11355 = vmatprep.subr.mxu1 %v11293_v35  ;;  %11352 = vmatprep.mubr.msk.f32.mxu0 %vm66_vm0, %v12834_v17 }
 0x69a   :  { %11350 = vmatprep.subr.mxu0 %v8401_v36  ;;  %11356 = vmatpush3.msra.mxu1 %v11293_v35 }
 0x69b   :  { %11351 = vmatpush3.msra.mxu0 %v8401_v36  ;;  %11358 = vmatmul.mubr.msk.f32.vlgmr.msra.gmra.mrb[10].mxu1 %vm66_vm0, %v12849_v23 }
 0x69c   :  { %v11296_v37 = vpop.f32.mrb[60].mxu1  ;;  %11353 = vmatmul.mubr.msk.f32.vlgmr.msra.gmra.mrb[10].mxu0 %vm66_vm0, %v12849_v23  ;;  %11367 = vmatprep.mubr.msk.f32.mxu1 %vm66_vm0, %v12834_v17 }
 0x69d   :  { %v8411_v38 = vpop.f32.mrb[61].mxu1  ;;  %11365 = vmatprep.subr.mxu1 %v11296_v37  ;;  %11362 = vmatprep.mubr.msk.f32.mxu0 %vm66_vm0, %v12834_v17 }
 0x69e   :  { %11360 = vmatprep.subr.mxu0 %v8411_v38  ;;  %11366 = vmatpush3.msra.mxu1 %v11296_v37 }
 0x69f   :  { %11361 = vmatpush3.msra.mxu0 %v8411_v38  ;;  %11368 = vmatmul.mubr.msk.f32.vlgmr.msra.gmra.mrb[12].mxu1 %vm66_vm0, %v12849_v23 }
 0x6a0   :  { %v11299_v39 = vpop.f32.mrb[62].mxu1  ;;  %11363 = vmatmul.mubr.msk.f32.vlgmr.msra.gmra.mrb[12].mxu0 %vm66_vm0, %v12849_v23  ;;  %11377 = vmatprep.mubr.msk.f32.mxu1 %vm66_vm0, %v12834_v17 }
 0x6a1   :  { %v8421_v40 = vpop.f32.mrb[63].mxu1  ;;  %11375 = vmatprep.subr.mxu1 %v11299_v39  ;;  %11372 = vmatprep.mubr.msk.f32.mxu0 %vm66_vm0, %v12834_v17 }
 0x6a2   :  { %11370 = vmatprep.subr.mxu0 %v8421_v40  ;;  %11376 = vmatpush3.msra.mxu1 %v11299_v39 }
 0x6a3   :  { %11371 = vmatpush3.msra.mxu0 %v8421_v40  ;;  %11378 = vmatmul.mubr.msk.f32.vlgmr.msra.gmra.mrb[14].mxu1 %vm66_vm0, %v12849_v23 }
 0x6a4   :  { %11373 = vmatmul.mubr.msk.f32.vlgmr.msra.gmra.mrb[14].mxu0 %vm66_vm0, %v12849_v23 }
 0x75a   :  { %v11309_v43 = vpop.f32.mrb[0].mxu1 }
 0x75b   :  { %v11574_v44 = vadd.f32 %v11309_v43, %v12913_v42  ;;  %v11304_v0 = vpop.f32.mrb[0].mxu0  ;;  %v8582_v45 = vpop.f32.mrb[1].mxu1 }
 0x75c   :  { %v11572_v46 = vadd.f32 %v11304_v0, %v12913_v42  ;;  %v11575_v47 = vadd.f32 %v8582_v45, %v12911_v41  ;;  %v8505_v48 = vpop.f32.mrb[1].mxu0 }
 0x75d   :  { %9674 = vst [vmem:[#allocation6 + $0x18] sm:$0xff] %v11574_v44  ;;  %v11573_v49 = vadd.f32 %v8505_v48, %v12911_v41 }
 0x75e   :  { %9672 = vst [vmem:[#allocation6 + $0x8] sm:$0xff] %v11572_v46  ;;  %9673 = vst [vmem:[#allocation6 + $0x10] sm:$0xff] %v11575_v47  ;;  %v11319_v50 = vpop.f32.mrb[2].mxu1 }
 0x75f   :  { %9671 = vst [vmem:[#allocation6] sm:$0xff] %v11573_v49  ;;  %v11578_v51 = vadd.f32 %v11319_v50, %v12913_v42  ;;  %v11314_v52 = vpop.f32.mrb[2].mxu0  ;;  %v8736_v3 = vpop.f32.mrb[3].mxu1 }
 0x760   :  { %v11576_v4 = vadd.f32 %v11314_v52, %v12913_v42  ;;  %v11579_v5 = vadd.f32 %v8736_v3, %v12911_v41  ;;  %v8659_v6 = vpop.f32.mrb[3].mxu0 }
 0x761   :  { %9678 = vst [vmem:[#allocation6 + $0x38] sm:$0xff] %v11578_v51  ;;  %v11577_v7 = vadd.f32 %v8659_v6, %v12911_v41 }
 0x762   :  { %9676 = vst [vmem:[#allocation6 + $0x28] sm:$0xff] %v11576_v4  ;;  %9677 = vst [vmem:[#allocation6 + $0x30] sm:$0xff] %v11579_v5  ;;  %v11329_v8 = vpop.f32.mrb[4].mxu1 }
 0x763   :  { %9675 = vst [vmem:[#allocation6 + $0x20] sm:$0xff] %v11577_v7  ;;  %v11582_v9 = vadd.f32 %v11329_v8, %v12913_v42  ;;  %v11324_v10 = vpop.f32.mrb[4].mxu0  ;;  %v8890_v11 = vpop.f32.mrb[5].mxu1 }
 0x764   :  { %v11580_v12 = vadd.f32 %v11324_v10, %v12913_v42  ;;  %v11583_v13 = vadd.f32 %v8890_v11, %v12911_v41  ;;  %v8813_v16 = vpop.f32.mrb[5].mxu0 }
 0x765   :  { %9682 = vst [vmem:[#allocation6 + $0x58] sm:$0xff] %v11582_v9  ;;  %v11581_v20 = vadd.f32 %v8813_v16, %v12911_v41 }
 0x766   :  { %9680 = vst [vmem:[#allocation6 + $0x48] sm:$0xff] %v11580_v12  ;;  %9681 = vst [vmem:[#allocation6 + $0x50] sm:$0xff] %v11583_v13  ;;  %v11339_v24 = vpop.f32.mrb[6].mxu1 }
 0x767   :  { %9679 = vst [vmem:[#allocation6 + $0x40] sm:$0xff] %v11581_v20  ;;  %v11586_v28 = vadd.f32 %v11339_v24, %v12913_v42  ;;  %v11334_v53 = vpop.f32.mrb[6].mxu0  ;;  %v9044_v54 = vpop.f32.mrb[7].mxu1 }
 0x768   :  { %v11584_v55 = vadd.f32 %v11334_v53, %v12913_v42  ;;  %v11587_v56 = vadd.f32 %v9044_v54, %v12911_v41  ;;  %v8967_v57 = vpop.f32.mrb[7].mxu0 }
 0x769   :  { %9686 = vst [vmem:[#allocation6 + $0x78] sm:$0xff] %v11586_v28  ;;  %v11585_v58 = vadd.f32 %v8967_v57, %v12911_v41 }
 0x76a   :  { %9684 = vst [vmem:[#allocation6 + $0x68] sm:$0xff] %v11584_v55  ;;  %9685 = vst [vmem:[#allocation6 + $0x70] sm:$0xff] %v11587_v56  ;;  %v11349_v59 = vpop.f32.mrb[8].mxu1 }
 0x76b   :  { %9683 = vst [vmem:[#allocation6 + $0x60] sm:$0xff] %v11585_v58  ;;  %v11590_v60 = vadd.f32 %v11349_v59, %v12913_v42  ;;  %v11344_v61 = vpop.f32.mrb[8].mxu0  ;;  %v9198_v62 = vpop.f32.mrb[9].mxu1 }
 0x76c   :  { %v11588_v63 = vadd.f32 %v11344_v61, %v12913_v42  ;;  %v11591_v1 = vadd.f32 %v9198_v62, %v12911_v41  ;;  %v9121_v2 = vpop.f32.mrb[9].mxu0 }
 0x76d   :  { %9690 = vst [vmem:[#allocation6 + $0x98] sm:$0xff] %v11590_v60  ;;  %v11589_v14 = vadd.f32 %v9121_v2, %v12911_v41 }
 0x76e   :  { %9688 = vst [vmem:[#allocation6 + $0x88] sm:$0xff] %v11588_v63  ;;  %9689 = vst [vmem:[#allocation6 + $0x90] sm:$0xff] %v11591_v1  ;;  %v11359_v15 = vpop.f32.mrb[10].mxu1 }
 0x76f   :  { %9687 = vst [vmem:[#allocation6 + $0x80] sm:$0xff] %v11589_v14  ;;  %v11594_v17 = vadd.f32 %v11359_v15, %v12913_v42  ;;  %v11354_v18 = vpop.f32.mrb[10].mxu0  ;;  %v9352_v19 = vpop.f32.mrb[11].mxu1 }
 0x770   :  { %v11592_v21 = vadd.f32 %v11354_v18, %v12913_v42  ;;  %v11595_v22 = vadd.f32 %v9352_v19, %v12911_v41  ;;  %v9275_v23 = vpop.f32.mrb[11].mxu0 }
 0x771   :  { %9694 = vst [vmem:[#allocation6 + $0xb8] sm:$0xff] %v11594_v17  ;;  %v11593_v25 = vadd.f32 %v9275_v23, %v12911_v41 }
 0x772   :  { %9692 = vst [vmem:[#allocation6 + $0xa8] sm:$0xff] %v11592_v21  ;;  %9693 = vst [vmem:[#allocation6 + $0xb0] sm:$0xff] %v11595_v22  ;;  %v11369_v26 = vpop.f32.mrb[12].mxu1 }
 0x773   :  { %9691 = vst [vmem:[#allocation6 + $0xa0] sm:$0xff] %v11593_v25  ;;  %v11598_v27 = vadd.f32 %v11369_v26, %v12913_v42  ;;  %v11364_v29 = vpop.f32.mrb[12].mxu0  ;;  %v9506_v30 = vpop.f32.mrb[13].mxu1 }
 0x774   :  { %v11596_v31 = vadd.f32 %v11364_v29, %v12913_v42  ;;  %v11599_v32 = vadd.f32 %v9506_v30, %v12911_v41  ;;  %v9429_v33 = vpop.f32.mrb[13].mxu0 }
 0x775   :  { %9698 = vst [vmem:[#allocation6 + $0xd8] sm:$0xff] %v11598_v27  ;;  %v11597_v34 = vadd.f32 %v9429_v33, %v12911_v41 }
 0x776   :  { %9696 = vst [vmem:[#allocation6 + $0xc8] sm:$0xff] %v11596_v31  ;;  %9697 = vst [vmem:[#allocation6 + $0xd0] sm:$0xff] %v11599_v32  ;;  %v11379_v35 = vpop.f32.mrb[14].mxu1 }
 0x777   :  { %9695 = vst [vmem:[#allocation6 + $0xc0] sm:$0xff] %v11597_v34  ;;  %v11602_v36 = vadd.f32 %v11379_v35, %v12913_v42  ;;  %v11374_v37 = vpop.f32.mrb[14].mxu0  ;;  %v9660_v38 = vpop.f32.mrb[15].mxu1 }
 0x778   :  { %v11600_v39 = vadd.f32 %v11374_v37, %v12913_v42  ;;  %v11603_v40 = vadd.f32 %v9660_v38, %v12911_v41  ;;  %v9583_v43 = vpop.f32.mrb[15].mxu0 }
 0x779   :  { %9702 = vst [vmem:[#allocation6 + $0xf8] sm:$0xff] %v11602_v36  ;;  %v11601_v44 = vadd.f32 %v9583_v43, %v12911_v41 }
 0x77a   :  { %9700 = vst [vmem:[#allocation6 + $0xe8] sm:$0xff] %v11600_v39  ;;  %9701 = vst [vmem:[#allocation6 + $0xf0] sm:$0xff] %v11603_v40 }
 0x77b   :  { %9699 = vst [vmem:[#allocation6 + $0xe0] sm:$0xff] %v11601_v44 }
 0x77c   :  { %11851 = shalt.err (!%p11848_p12)
}
 0x77d   :  { %s11852_s29 = scalar_lea.hbm %s12967_s5, 4096 }
 0x77e   :  { %p11853_p13 = scmp.ne.s32.totalorder %s12967_s5, %s11852_s29  ;;  %p11856_p0 = scmp.lt.u32.totalorder %s11852_s29, %s12967_s5 }
 0x780   :  { %p11858_p1 = pnand %p11856_p0, %p11853_p13 }
 0x782   :  { %11861 = shalt.err (!%p11858_p1)
}
 0x783   :  { %9714 = dma.vmem_to_hbm [thread:$0]  %s9709_s4, 4096, %s12967_s5, [#allocation5], %s11867_s27, %s11867_s27, %s11868_s28  }
 0x784   :  { %11864 = dma.done.wait [#allocation5], 4096  }
 0x785   :  { %11865 = vsyncadd [#allocation5], 4294963200 }
 0x786   :  { %9718 = vsyncpa [#allocation4], 1 }
 0x787   :  { %9719 = vsyncpa [#allocation5], 1 }

</bundles_post_ra>
